<compile_context>
chip_gen: v7x
topology: tpu7x:2x2x1
jax: 0.10.0
libtpu: 0.0.40
codegen_flags: <defaults>
</compile_context>

<pallas_src>
import jax
import jax.numpy as jnp
from jax.experimental import pallas as pl
from jax.experimental.pallas import tpu as pltpu

# Decoder hyperparameters (as instantiated inside GraphTCN).
OBS_LEN = 12
PRE_LEN = 8
FIN = 48           # per-step input feature size fed to the decoder
FOUT = 2           # per-step output feature size
NOISE_DIM = 16
M_SAMPLES = 20
N_AGENTS = 5

DIN = FIN * OBS_LEN            # 576
DCAT = DIN + NOISE_DIM         # 592  (cat((x, noise), 1) width)
DOUT = PRE_LEN * FOUT          # 16
DEC_H1 = 390
DEC_H2 = 204

ROWS = M_SAMPLES * N_AGENTS    # 100 MLP rows per scene
ROWS_PAD = 128                 # pad to a clean sublane-aligned row count

LRELU_SLOPE = 0.2              # nn.LeakyReLU(0.2) in the reference module


def _lrelu(v):
    return jnp.where(v >= 0, v, LRELU_SLOPE * v)


def decoder_kernel(xn_ref, w1_ref, b1_ref, w2_ref, b2_ref, w3_ref, b3_ref,
                   out_ref):
    """One scene: (ROWS_PAD, DCAT) bf16 rows -> (ROWS_PAD, DOUT) f32."""
    # Layer 1: fused cat((x, noise), 1) @ W1 (bf16 operands, f32 accumulate).
    h = jnp.dot(xn_ref[...], w1_ref[...], preferred_element_type=jnp.float32)
    h = _lrelu(h + b1_ref[...])
    # Layer 2.
    h = jnp.dot(h.astype(jnp.bfloat16), w2_ref[...],
                preferred_element_type=jnp.float32)
    h = _lrelu(h + b2_ref[...])
    # Layer 3 (+ final LeakyReLU, as in the nn.Sequential).
    h = jnp.dot(h.astype(jnp.bfloat16), w3_ref[...],
                preferred_element_type=jnp.float32)
    out_ref[...] = _lrelu(h + b3_ref[...])


def decoder_forward_batched(x, noise, params):
    """x: (B, N, DIN) f32, noise: (B, M, N, NOISE_DIM) f32
       -> (B, M, N, PRE_LEN, FOUT) f32."""
    b, n, _ = x.shape
    m = noise.shape[1]
    rows = m * n
    assert rows <= ROWS_PAD, (rows, ROWS_PAD)

    # Build per-scene MLP input rows: [x tiled over M | noise], bf16, padded.
    x_t = jnp.broadcast_to(x[:, None, :, :], (b, m, n, DIN)).reshape(b, rows, DIN)
    xn = jnp.concatenate([x_t, noise.reshape(b, rows, NOISE_DIM)], axis=-1)
    xn = xn.astype(jnp.bfloat16)
    xn = jnp.pad(xn, ((0, 0), (0, ROWS_PAD - rows), (0, 0)))
    xn = xn.reshape(b * ROWS_PAD, DCAT)

    # Advisory cost estimate (lets XLA schedule around this latency-bound call).
    flops = 2 * b * ROWS_PAD * (DCAT * DEC_H1 + DEC_H1 * DEC_H2 + DEC_H2 * DOUT)
    weight_bytes = 2 * (DCAT * DEC_H1 + DEC_H1 * DEC_H2 + DEC_H2 * DOUT)  # bf16
    bias_bytes = 4 * (DEC_H1 + DEC_H2 + DOUT)
    io_bytes = b * ROWS_PAD * (2 * DCAT + 4 * DOUT)

    vmem = pltpu.MemorySpace.VMEM
    grid_spec = pltpu.PrefetchScalarGridSpec(
        num_scalar_prefetch=0,
        grid=(b,),
        in_specs=[
            # Per-scene input rows.
            pl.BlockSpec((ROWS_PAD, DCAT), lambda i: (i, 0), memory_space=vmem),
            # Weights / biases: constant block index -> fetched once, then
            # VMEM-resident across all grid steps.
            pl.BlockSpec((DCAT, DEC_H1), lambda i: (0, 0), memory_space=vmem),
            pl.BlockSpec((1, DEC_H1), lambda i: (0, 0), memory_space=vmem),
            pl.BlockSpec((DEC_H1, DEC_H2), lambda i: (0, 0), memory_space=vmem),
            pl.BlockSpec((1, DEC_H2), lambda i: (0, 0), memory_space=vmem),
            pl.BlockSpec((DEC_H2, DOUT), lambda i: (0, 0), memory_space=vmem),
            pl.BlockSpec((1, DOUT), lambda i: (0, 0), memory_space=vmem),
        ],
        out_specs=pl.BlockSpec((ROWS_PAD, DOUT), lambda i: (i, 0),
                               memory_space=vmem),
    )

    out = pl.pallas_call(
        decoder_kernel,
        out_shape=jax.ShapeDtypeStruct((b * ROWS_PAD, DOUT), jnp.float32),
        grid_spec=grid_spec,
        compiler_params=pltpu.CompilerParams(
            # Scene axis is independent -> megacore-shardable on v7x.
            dimension_semantics=("parallel",),
            vmem_limit_bytes=16 * 1024 * 1024,
        ),
        cost_estimate=pl.CostEstimate(
            flops=flops,
            transcendentals=0,
            bytes_accessed=weight_bytes + bias_bytes + io_bytes,
        ),
    )(xn, params["w1"], params["b1"], params["w2"], params["b2"],
      params["w3"], params["b3"])

    # (B*ROWS_PAD, DOUT) -> drop pad rows -> (B, M, N, pre_len, fout).
    out = out.reshape(b, ROWS_PAD, DOUT)[:, :rows]
    return out.reshape(b, m, n, PRE_LEN, FOUT)


def decoder_forward(x, noise, params):
    """Single scene (matches the PyTorch module's forward signature):
       x: (N, fin*obs_len), noise: (M, N, noise_dim) -> (M, N, pre_len, fout)."""
    return decoder_forward_batched(x[None], noise[None], params)[0]


def init_params(key):
    """Deterministic synthetic parameters with PyTorch-Linear-like scaling.
    Weights are pre-cast to bf16 once here (MXU-native, halves weight DMA);
    biases stay f32."""
    ks = jax.random.split(key, 6)

    def u(k, shape, fan_in):
        bound = float(fan_in) ** -0.5
        return jax.random.uniform(k, shape, jnp.float32, -bound, bound)

    w1 = u(ks[0], (DCAT, DEC_H1), DCAT)       # Linear(DIN+NOISE_DIM, 390)
    b1 = u(ks[1], (1, DEC_H1), DCAT)
    w2 = u(ks[2], (DEC_H1, DEC_H2), DEC_H1)   # Linear(390, 204)
    b2 = u(ks[3], (1, DEC_H2), DEC_H1)
    w3 = u(ks[4], (DEC_H2, DOUT), DEC_H2)     # Linear(204, pre_len*fout)
    b3 = u(ks[5], (1, DOUT), DEC_H2)

    # NOTE: int8 (v6e) / fp8 (v7x) weight quantization with per-channel scales
    # would further cut the dominant weight DMA; left as bf16 for accuracy.
    return {
        "w1": w1.astype(jnp.bfloat16), "b1": b1,
        "w2": w2.astype(jnp.bfloat16), "b2": b2,
        "w3": w3.astype(jnp.bfloat16), "b3": b3,
    }


if __name__ == "__main__":
    key = jax.random.PRNGKey(0)
    k_x, k_noise, k_param = jax.random.split(key, 3)

    x = jax.random.normal(k_x, (N_AGENTS, DIN), jnp.float32)
    # Deterministic stand-in for the per-sample torch.randn noise.
    noise = jax.random.normal(k_noise, (M_SAMPLES, N_AGENTS, NOISE_DIM),
                              jnp.float32)
    params = init_params(k_param)

    out = jax.jit(decoder_forward)(x, noise, params)
    out = jax.block_until_ready(out)

    assert out.shape == (M_SAMPLES, N_AGENTS, PRE_LEN, FOUT), out.shape
    assert bool(jnp.all(jnp.isfinite(out)))
    print("KERNEL_OK")
</pallas_src>

<mosaic_0001>
module attributes {stable_mosaic.version = 11 : i64} {
  func.func @decoder_kernel(%arg0: i32, %arg1: memref<128x592xbf16, #tpu.memory_space<vmem>>, %arg2: memref<592x390xbf16, #tpu.memory_space<vmem>>, %arg3: memref<1x390xf32, #tpu.memory_space<vmem>>, %arg4: memref<390x204xbf16, #tpu.memory_space<vmem>>, %arg5: memref<1x204xf32, #tpu.memory_space<vmem>>, %arg6: memref<204x16xbf16, #tpu.memory_space<vmem>>, %arg7: memref<1x16xf32, #tpu.memory_space<vmem>>, %arg8: memref<128x16xf32, #tpu.memory_space<vmem>>) attributes {dimension_semantics = [#tpu.dimension_semantics<parallel>], iteration_bounds = array<i64: 1>, scalar_prefetch = 0 : i64, scratch_operands = 0 : i64, tpu.core_type = #tpu.core_type<tc>, window_params = [{transform_indices = @transform_0, window_bounds = array<i64: 128, 592>}, {pipeline_mode = #tpu.pipeline_mode<synchronous>, transform_indices = @transform_1, window_bounds = array<i64: 592, 390>}, {pipeline_mode = #tpu.pipeline_mode<synchronous>, transform_indices = @transform_2, window_bounds = array<i64: 1, 390>}, {pipeline_mode = #tpu.pipeline_mode<synchronous>, transform_indices = @transform_3, window_bounds = array<i64: 390, 204>}, {pipeline_mode = #tpu.pipeline_mode<synchronous>, transform_indices = @transform_4, window_bounds = array<i64: 1, 204>}, {pipeline_mode = #tpu.pipeline_mode<synchronous>, transform_indices = @transform_5, window_bounds = array<i64: 204, 16>}, {pipeline_mode = #tpu.pipeline_mode<synchronous>, transform_indices = @transform_6, window_bounds = array<i64: 1, 16>}, {transform_indices = @transform_7, window_bounds = array<i64: 128, 16>}]} {
    %c0 = arith.constant 0 : index
    %c0_0 = arith.constant 0 : index
    %0 = vector.load %arg1[%c0, %c0_0] : memref<128x592xbf16, #tpu.memory_space<vmem>>, vector<128x592xbf16>
    %c0_1 = arith.constant 0 : index
    %c0_2 = arith.constant 0 : index
    %1 = vector.load %arg2[%c0_1, %c0_2] : memref<592x390xbf16, #tpu.memory_space<vmem>>, vector<592x390xbf16>
    %cst = arith.constant dense<0.000000e+00> : vector<128x390xf32>
    %2 = tpu.matmul %0, %1, %cst {dimension_numbers = #tpu.dot_dimension_numbers<[1], [0], [0], [1], [0, 0, 1, 1], [], []>} : vector<128x592xbf16>, vector<592x390xbf16>, vector<128x390xf32> -> vector<128x390xf32>
    %c0_3 = arith.constant 0 : index
    %c0_4 = arith.constant 0 : index
    %3 = vector.load %arg3[%c0_3, %c0_4] : memref<1x390xf32, #tpu.memory_space<vmem>>, vector<1x390xf32>
    %4 = vector.broadcast %3 : vector<1x390xf32> to vector<128x390xf32>
    %5 = arith.addf %2, %4 : vector<128x390xf32>
    %cst_5 = arith.constant 0.000000e+00 : f32
    %6 = vector.broadcast %cst_5 : f32 to vector<128x390xf32>
    %7 = arith.cmpf oge, %5, %6 : vector<128x390xf32>
    %cst_6 = arith.constant 2.000000e-01 : f32
    %8 = vector.broadcast %cst_6 : f32 to vector<128x390xf32>
    %9 = arith.mulf %8, %5 : vector<128x390xf32>
    %10 = arith.select %7, %5, %9 : vector<128x390xi1>, vector<128x390xf32>
    %11 = arith.truncf %10 : vector<128x390xf32> to vector<128x390xbf16>
    %c0_7 = arith.constant 0 : index
    %c0_8 = arith.constant 0 : index
    %12 = vector.load %arg4[%c0_7, %c0_8] : memref<390x204xbf16, #tpu.memory_space<vmem>>, vector<390x204xbf16>
    %cst_9 = arith.constant dense<0.000000e+00> : vector<128x204xf32>
    %13 = tpu.matmul %11, %12, %cst_9 {dimension_numbers = #tpu.dot_dimension_numbers<[1], [0], [0], [1], [0, 0, 1, 1], [], []>} : vector<128x390xbf16>, vector<390x204xbf16>, vector<128x204xf32> -> vector<128x204xf32>
    %c0_10 = arith.constant 0 : index
    %c0_11 = arith.constant 0 : index
    %14 = vector.load %arg5[%c0_10, %c0_11] : memref<1x204xf32, #tpu.memory_space<vmem>>, vector<1x204xf32>
    %15 = vector.broadcast %14 : vector<1x204xf32> to vector<128x204xf32>
    %16 = arith.addf %13, %15 : vector<128x204xf32>
    %cst_12 = arith.constant 0.000000e+00 : f32
    %17 = vector.broadcast %cst_12 : f32 to vector<128x204xf32>
    %18 = arith.cmpf oge, %16, %17 : vector<128x204xf32>
    %cst_13 = arith.constant 2.000000e-01 : f32
    %19 = vector.broadcast %cst_13 : f32 to vector<128x204xf32>
    %20 = arith.mulf %19, %16 : vector<128x204xf32>
    %21 = arith.select %18, %16, %20 : vector<128x204xi1>, vector<128x204xf32>
    %22 = arith.truncf %21 : vector<128x204xf32> to vector<128x204xbf16>
    %c0_14 = arith.constant 0 : index
    %c0_15 = arith.constant 0 : index
    %23 = vector.load %arg6[%c0_14, %c0_15] : memref<204x16xbf16, #tpu.memory_space<vmem>>, vector<204x16xbf16>
    %cst_16 = arith.constant dense<0.000000e+00> : vector<128x16xf32>
    %24 = tpu.matmul %22, %23, %cst_16 {dimension_numbers = #tpu.dot_dimension_numbers<[1], [0], [0], [1], [0, 0, 1, 1], [], []>} : vector<128x204xbf16>, vector<204x16xbf16>, vector<128x16xf32> -> vector<128x16xf32>
    %c0_17 = arith.constant 0 : index
    %c0_18 = arith.constant 0 : index
    %25 = vector.load %arg7[%c0_17, %c0_18] : memref<1x16xf32, #tpu.memory_space<vmem>>, vector<1x16xf32>
    %26 = vector.broadcast %25 : vector<1x16xf32> to vector<128x16xf32>
    %27 = arith.addf %24, %26 : vector<128x16xf32>
    %cst_19 = arith.constant 0.000000e+00 : f32
    %28 = vector.broadcast %cst_19 : f32 to vector<128x16xf32>
    %29 = arith.cmpf oge, %27, %28 : vector<128x16xf32>
    %cst_20 = arith.constant 2.000000e-01 : f32
    %30 = vector.broadcast %cst_20 : f32 to vector<128x16xf32>
    %31 = arith.mulf %30, %27 : vector<128x16xf32>
    %32 = arith.select %29, %27, %31 : vector<128x16xi1>, vector<128x16xf32>
    %c0_21 = arith.constant 0 : index
    %c0_22 = arith.constant 0 : index
    %33 = vector.load %arg8[%c0_21, %c0_22] : memref<128x16xf32, #tpu.memory_space<vmem>>, vector<128x16xf32>
    tpu.vector_store %arg8[%c0_21, %c0_22], %32 {strides = array<i32>} : memref<128x16xf32, #tpu.memory_space<vmem>>, vector<128x16xf32>,
    return
  }
  func.func @transform_0(%arg0: i32) -> (i32, i32) {
    %c0_i32 = arith.constant 0 : i32
    %c0_i32_0 = arith.constant 0 : i32
    return %arg0, %c0_i32 : i32, i32
  }
  func.func @transform_1(%arg0: i32) -> (i32, i32) {
    %c0_i32 = arith.constant 0 : i32
    %c0_i32_0 = arith.constant 0 : i32
    %c0_i32_1 = arith.constant 0 : i32
    return %c0_i32, %c0_i32_0 : i32, i32
  }
  func.func @transform_2(%arg0: i32) -> (i32, i32) {
    %c0_i32 = arith.constant 0 : i32
    %c0_i32_0 = arith.constant 0 : i32
    %c0_i32_1 = arith.constant 0 : i32
    return %c0_i32, %c0_i32_0 : i32, i32
  }
  func.func @transform_3(%arg0: i32) -> (i32, i32) {
    %c0_i32 = arith.constant 0 : i32
    %c0_i32_0 = arith.constant 0 : i32
    %c0_i32_1 = arith.constant 0 : i32
    return %c0_i32, %c0_i32_0 : i32, i32
  }
  func.func @transform_4(%arg0: i32) -> (i32, i32) {
    %c0_i32 = arith.constant 0 : i32
    %c0_i32_0 = arith.constant 0 : i32
    %c0_i32_1 = arith.constant 0 : i32
    return %c0_i32, %c0_i32_0 : i32, i32
  }
  func.func @transform_5(%arg0: i32) -> (i32, i32) {
    %c0_i32 = arith.constant 0 : i32
    %c0_i32_0 = arith.constant 0 : i32
    %c0_i32_1 = arith.constant 0 : i32
    return %c0_i32, %c0_i32_0 : i32, i32
  }
  func.func @transform_6(%arg0: i32) -> (i32, i32) {
    %c0_i32 = arith.constant 0 : i32
    %c0_i32_0 = arith.constant 0 : i32
    %c0_i32_1 = arith.constant 0 : i32
    return %c0_i32, %c0_i32_0 : i32, i32
  }
  func.func @transform_7(%arg0: i32) -> (i32, i32) {
    %c0_i32 = arith.constant 0 : i32
    %c0_i32_0 = arith.constant 0 : i32
    return %arg0, %c0_i32 : i32, i32
  }
}

</mosaic_0001>

<bundles_post_ra>
// kernel: decoder_forward.1
= control target key start
LH: loop header
LB: loop body
LE: loop exit
PB: predicated region body
PF: predicated region fallthrough
CT: control target
= control target key end

     0   :  { %v4032_v1 = vmov 0   ;;  %vm1185_vm0 = vcmask 654336   ;;  %s5332_s1 = inlined_call_operand.vmem [shape: bf16[592,390], index: 1, kind: input, shape index: {}]   ;;  %s5333_s0 = inlined_call_operand.vmem [shape: bf16[128,592], index: 0, kind: input, shape index: {}]   ;;  %s5334_s3 = inlined_call_operand.vmem [shape: bf16[390,204], index: 3, kind: input, shape index: {}]   ;;  %s5335_s2 = inlined_call_operand.vmem [shape: f32[1,390], index: 2, kind: input, shape index: {}]   ;;  %s5336_s5 = inlined_call_operand.vmem [shape: bf16[204,16], index: 5, kind: input, shape index: {}]   ;;  %s5337_s4 = inlined_call_operand.vmem [shape: f32[1,204], index: 4, kind: input, shape index: {}]   ;;  %s5338_s6 = inlined_call_operand.vmem [shape: f32[1,16], index: 6, kind: input, shape index: {}]   ;;  %s5339_s7 = inlined_call_operand.vmem [shape: f32[128,16], index: 7, kind: output, shape index: {}]  }
   0x1   :  { %v3661_v0 = vld [vmem:[%s5332_s1 + $0x4] ss:$16 sps:$4 sm:$0xff]   ;;  %1468 = vmatprep.mubr.bf16.mxu1 %v4032_v1  ;;  %v3665_v3 = vld [vmem:[%s5332_s1] ss:$16 sps:$4 sm:$0xff]   ;;  %v3696_v22 = vld [vmem:[%s5332_s1 + $0xc] ss:$16 sps:$4 sm:$0xff]  }
   0x2   :  { %v3663_v2 = vld [vmem:[%s5332_s1 + $0x404] ss:$16 sps:$4 sm:$0xff]   ;;  %1210 = vmatprep.subr.bf16.mxu0 %v3661_v0  ;;  %v3666_v4 = vld [vmem:[%s5332_s1 + $0x400] ss:$16 sps:$4 sm:$0xff]   ;;  %v3694_v24 = vld [vmem:[%s5332_s1 + $0x8] ss:$16 sps:$4 sm:$0xff]  }
   0x3   :  { %1436 = vmatprep.subr.bf16.mxu1 %v3663_v2  ;;  %v3667_v5 = vld [vmem:[%s5332_s1 + $0x24] ss:$16 sps:$4 sm:$0xff]   ;;  %1211 = vmatpush1.bf16.msra.mxu0 %v3665_v3  ;;  %v3671_v7 = vld [vmem:[%s5332_s1 + $0x20] ss:$16 sps:$4 sm:$0xff]   ;;  %v3702_v27 = vld [vmem:[%s5332_s1 + $0x2c] ss:$16 sps:$4 sm:$0xff]  }
   0x4   :  { %1437 = vmatpush1.bf16.msra.mxu1 %v3666_v4  ;;  %v3669_v6 = vld [vmem:[%s5332_s1 + $0x424] ss:$16 sps:$4 sm:$0xff]   ;;  %1212 = vmatprep.subr.bf16.mxu0 %v3667_v5  ;;  %v3672_v8 = vld [vmem:[%s5332_s1 + $0x420] ss:$16 sps:$4 sm:$0xff]   ;;  %v3700_v28 = vld [vmem:[%s5332_s1 + $0x28] ss:$16 sps:$4 sm:$0xff]  }
   0x5   :  { %1438 = vmatprep.subr.bf16.mxu1 %v3669_v6  ;;  %v3673_v9 = vld [vmem:[%s5332_s1 + $0x44] ss:$16 sps:$4 sm:$0xff]   ;;  %v3677_v11 = vld [vmem:[%s5332_s1 + $0x40] ss:$16 sps:$4 sm:$0xff]   ;;  %v3709_v31 = vld [vmem:[%s5332_s1 + $0x4c] ss:$16 sps:$4 sm:$0xff]  }
   0x6   :  { %v3675_v10 = vld [vmem:[%s5332_s1 + $0x444] ss:$16 sps:$4 sm:$0xff]   ;;  %v3678_v12 = vld [vmem:[%s5332_s1 + $0x440] ss:$16 sps:$4 sm:$0xff]   ;;  %v3706_v32 = vld [vmem:[%s5333_s0 + $0x38] ss:$20 sps:$4 sm:$0xff]  }
   0x7   :  { %1213 = vmatpush1.bf16.msra.mxu0 %v3671_v7  ;;  %v3679_v13 = vld [vmem:[%s5332_s1 + $0x64] ss:$16 sps:$4 sm:$0xff]   ;;  %v3683_v15 = vld [vmem:[%s5332_s1 + $0x60] ss:$16 sps:$4 sm:$0xff]   ;;  %v3707_v33 = vld [vmem:[%s5332_s1 + $0x48] ss:$16 sps:$4 sm:$0xff]  }
   0x8   :  { %1439 = vmatpush1.bf16.msra.mxu1 %v3672_v8  ;;  %1214 = vmatprep.subr.bf16.mxu0 %v3673_v9  ;;  %v3681_v14 = vld [vmem:[%s5332_s1 + $0x464] ss:$16 sps:$4 sm:$0xff]   ;;  %v3684_v16 = vld [vmem:[%s5332_s1 + $0x460] ss:$16 sps:$4 sm:$0xff]   ;;  %v3715_v36 = vld [vmem:[%s5332_s1 + $0x6c] ss:$16 sps:$4 sm:$0xff]  }
   0x9   :  { %1440 = vmatprep.subr.bf16.mxu1 %v3675_v10  ;;  %v3685_v17 = vld [vmem:[%s5332_s1 + $0x84] ss:$16 sps:$4 sm:$0xff]   ;;  %v3689_v19 = vld [vmem:[%s5332_s1 + $0x80] ss:$16 sps:$4 sm:$0xff]   ;;  %v3713_v37 = vld [vmem:[%s5332_s1 + $0x68] ss:$16 sps:$4 sm:$0xff]  }
   0xa   :  { %v3687_v18 = vld [vmem:[%s5332_s1 + $0x484] ss:$16 sps:$4 sm:$0xff]   ;;  %v3690_v20 = vld [vmem:[%s5332_s1 + $0x480] ss:$16 sps:$4 sm:$0xff]   ;;  %v3722_v40 = vld [vmem:[%s5332_s1 + $0x8c] ss:$16 sps:$4 sm:$0xff]  }
   0xb   :  { %1215 = vmatpush1.bf16.msra.mxu0 %v3677_v11  ;;  %v3691_v21 = vld [vmem:[%s5332_s1 + $0xa4] ss:$16 sps:$4 sm:$0xff]   ;;  %v3697_v25 = vld [vmem:[%s5332_s1 + $0xa0] ss:$16 sps:$4 sm:$0xff]   ;;  %v3720_v42 = vld [vmem:[%s5332_s1 + $0x88] ss:$16 sps:$4 sm:$0xff]  }
   0xc   :  { %1441 = vmatpush1.bf16.msra.mxu1 %v3678_v12  ;;  %1216 = vmatprep.subr.bf16.mxu0 %v3679_v13  ;;  %v3693_v23 = vld [vmem:[%s5333_s0 + $0x10] ss:$20 sps:$4 sm:$0xff]   ;;  %v3719_v41 = vld [vmem:[%s5333_s0 + $0x60] ss:$20 sps:$4 sm:$0xff]   ;;  %v3728_v45 = vld [vmem:[%s5332_s1 + $0xac] ss:$16 sps:$4 sm:$0xff]  }
   0xd   :  { %1442 = vmatprep.subr.bf16.mxu1 %v3681_v14  ;;  %v3698_v26 = vld [vmem:[%s5332_s1 + $0xc4] ss:$16 sps:$4 sm:$0xff]   ;;  %v3703_v29 = vld [vmem:[%s5332_s1 + $0xc0] ss:$16 sps:$4 sm:$0xff]   ;;  %v3726_v46 = vld [vmem:[%s5332_s1 + $0xa8] ss:$16 sps:$4 sm:$0xff]  }
   0xe   :  { %v3704_v30 = vld [vmem:[%s5332_s1 + $0xe4] ss:$16 sps:$4 sm:$0xff]   ;;  %v3710_v34 = vld [vmem:[%s5332_s1 + $0xe0] ss:$16 sps:$4 sm:$0xff]   ;;  %v3735_v49 = vld [vmem:[%s5332_s1 + $0xcc] ss:$16 sps:$4 sm:$0xff]  }
   0xf   :  { %1217 = vmatpush1.bf16.msra.mxu0 %v3683_v15  ;;  %v3711_v35 = vld [vmem:[%s5332_s1 + $0x104] ss:$16 sps:$4 sm:$0xff]   ;;  %v3716_v38 = vld [vmem:[%s5332_s1 + $0x100] ss:$16 sps:$4 sm:$0xff]   ;;  %v3732_v50 = vld [vmem:[%s5333_s0 + $0x88] ss:$20 sps:$4 sm:$0xff]  }
  0x10   :  { %1443 = vmatpush1.bf16.msra.mxu1 %v3684_v16  ;;  %1218 = vmatprep.subr.bf16.mxu0 %v3685_v17  ;;  %v3717_v39 = vld [vmem:[%s5332_s1 + $0x124] ss:$16 sps:$4 sm:$0xff]   ;;  %v3723_v43 = vld [vmem:[%s5332_s1 + $0x120] ss:$16 sps:$4 sm:$0xff]   ;;  %v3733_v51 = vld [vmem:[%s5332_s1 + $0xc8] ss:$16 sps:$4 sm:$0xff]  }
  0x11   :  { %1444 = vmatprep.subr.bf16.mxu1 %v3687_v18  ;;  %v3724_v44 = vld [vmem:[%s5332_s1 + $0x144] ss:$16 sps:$4 sm:$0xff]   ;;  %v3729_v47 = vld [vmem:[%s5332_s1 + $0x140] ss:$16 sps:$4 sm:$0xff]   ;;  %v3741_v54 = vld [vmem:[%s5332_s1 + $0xec] ss:$16 sps:$4 sm:$0xff]  }
  0x12   :  { %v3730_v48 = vld [vmem:[%s5332_s1 + $0x164] ss:$16 sps:$4 sm:$0xff]   ;;  %v3736_v52 = vld [vmem:[%s5332_s1 + $0x160] ss:$16 sps:$4 sm:$0xff]   ;;  %v3739_v55 = vld [vmem:[%s5332_s1 + $0xe8] ss:$16 sps:$4 sm:$0xff]  }
  0x13   :  { %1219 = vmatpush1.bf16.msra.mxu0 %v3689_v19  ;;  %v3737_v53 = vld [vmem:[%s5332_s1 + $0x184] ss:$16 sps:$4 sm:$0xff]   ;;  %v3742_v56 = vld [vmem:[%s5332_s1 + $0x180] ss:$16 sps:$4 sm:$0xff]   ;;  %v3748_v58 = vld [vmem:[%s5332_s1 + $0x10c] ss:$16 sps:$4 sm:$0xff]  }
  0x14   :  { %1445 = vmatpush1.bf16.msra.mxu1 %v3690_v20  ;;  %1220 = vmatprep.subr.bf16.mxu0 %v3691_v21  ;;  %v3743_v57 = vld [vmem:[%s5332_s1 + $0x1a4] ss:$16 sps:$4 sm:$0xff]   ;;  %v3746_v61 = vld [vmem:[%s5332_s1 + $0x108] ss:$16 sps:$4 sm:$0xff]   ;;  %v3749_v62 = vld [vmem:[%s5332_s1 + $0x1a0] ss:$16 sps:$4 sm:$0xff]  }
  0x15   :  { %1549 = vmatprep.subr.bf16.mxu1 %v3696_v22  ;;  %v4258_v59 = vld [vmem:[%s5333_s0 + $0x4] ss:$20 sps:$4 sm:$0xff]   ;;  %v3754_v0 = vld [vmem:[%s5332_s1 + $0x12c] ss:$16 sps:$4 sm:$0xff]   ;;  %v3755_v3 = vld [vmem:[%s5332_s1 + $0x1c0] ss:$16 sps:$4 sm:$0xff]  }
  0x16   :  { %v3745_v60 = vld [vmem:[%s5333_s0 + $0xb0] ss:$20 sps:$4 sm:$0xff]   ;;  %1242 = vmatprep.mubr.bf16.mxu0 %v4258_v59  ;;  %v3752_v2 = vld [vmem:[%s5332_s1 + $0x128] ss:$16 sps:$4 sm:$0xff]   ;;  %v3761_v5 = vld [vmem:[%s5332_s1 + $0x14c] ss:$16 sps:$4 sm:$0xff]  }
  0x17   :  { %3281 = vmatmul.mubr.msk.bf16.vlgmr.msra.gmra.mrb[0].mxu1 %vm1185_vm0, %v3693_v23  ;;  %1221 = vmatpush1.bf16.msra.mxu0 %v3697_v25  ;;  %v3750_v63 = vld [vmem:[%s5332_s1 + $0x1c4] ss:$16 sps:$4 sm:$0xff]   ;;  %v3758_v6 = vld [vmem:[%s5333_s0 + $0xd8] ss:$20 sps:$4 sm:$0xff]   ;;  %v3762_v8 = vld [vmem:[%s5332_s1 + $0x1e0] ss:$16 sps:$4 sm:$0xff]  }
  0x18   :  { %1550 = vmatpush1.bf16.msra.mxu1 %v3694_v24  ;;  %1222 = vmatprep.subr.bf16.mxu0 %v3698_v26  ;;  %v3756_v4 = vld [vmem:[%s5332_s1 + $0x1e4] ss:$16 sps:$4 sm:$0xff]   ;;  %v3759_v7 = vld [vmem:[%s5332_s1 + $0x148] ss:$16 sps:$4 sm:$0xff]   ;;  %v3771_v10 = vld [vmem:[%s5332_s1 + $0x16c] ss:$16 sps:$4 sm:$0xff]  }
  0x19   :  { %1551 = vmatprep.subr.bf16.mxu1 %v3702_v27  ;;  %1478 = vmatprep.mubr.bf16.mxu1 %v4032_v1  ;;  %v3768_v9 = vld [vmem:[%s5332_s1 + $0x204] ss:$16 sps:$4 sm:$0xff]   ;;  %v3766_v12 = vld [vmem:[%s5332_s1 + $0x200] ss:$16 sps:$4 sm:$0xff]   ;;  %v3769_v13 = vld [vmem:[%s5332_s1 + $0x168] ss:$16 sps:$4 sm:$0xff]  }
  0x1a   :  { %v4309_v11 = vld [vmem:[%s5333_s0] ss:$20 sps:$4 sm:$0xff]   ;;  %v3778_v15 = vld [vmem:[%s5332_s1 + $0x18c] ss:$16 sps:$4 sm:$0xff]   ;;  %v3776_v19 = vld [vmem:[%s5332_s1 + $0x188] ss:$16 sps:$4 sm:$0xff]  }
  0x1b   :  { %1223 = vmatpush1.bf16.msra.mxu0 %v3703_v29  ;;  %v3774_v14 = vld [vmem:[%s5332_s1 + $0x224] ss:$16 sps:$4 sm:$0xff]   ;;  %v3772_v16 = vld [vmem:[%s5332_s1 + $0x220] ss:$16 sps:$4 sm:$0xff]   ;;  %v3787_v21 = vld [vmem:[%s5332_s1 + $0x1ac] ss:$16 sps:$4 sm:$0xff]  }
  0x1c   :  { %1552 = vmatpush1.bf16.msra.mxu1 %v3700_v28  ;;  %1224 = vmatprep.subr.bf16.mxu0 %v3704_v30  ;;  %v4331_v17 = vld [vmem:[%s5333_s0 + $0x2c] ss:$20 sps:$4 sm:$0xff]   ;;  %v3784_v20 = vld [vmem:[%s5332_s1 + $0x244] ss:$16 sps:$4 sm:$0xff]   ;;  %v4352_v22 = vld [vmem:[%s5333_s0 + $0x28] ss:$20 sps:$4 sm:$0xff]  }
  0x1d   :  { %1553 = vmatprep.subr.bf16.mxu1 %v3709_v31  ;;  %v4337_v18 = vld [vmem:[%s5333_s0 + $0x100] ss:$20 sps:$4 sm:$0xff]   ;;  %v3785_v24 = vld [vmem:[%s5332_s1 + $0x1a8] ss:$16 sps:$4 sm:$0xff]   ;;  %v3794_v26 = vld [vmem:[%s5332_s1 + $0x1cc] ss:$16 sps:$4 sm:$0xff]  }
  0x1e   :  { %v3782_v23 = vld [vmem:[%s5332_s1 + $0x240] ss:$16 sps:$4 sm:$0xff]   ;;  %v3790_v25 = vld [vmem:[%s5332_s1 + $0x264] ss:$16 sps:$4 sm:$0xff]   ;;  %v4381_v29 = vld [vmem:[%s5333_s0 + $0x128] ss:$20 sps:$4 sm:$0xff]  }
  0x1f   :  { %3282 = vmatmul.mubr.msk.bf16.gmra.mrb[4].mxu1 %vm1185_vm0, %v3706_v32  ;;  %1225 = vmatpush1.bf16.msra.mxu0 %v3710_v34  ;;  %v3788_v27 = vld [vmem:[%s5332_s1 + $0x260] ss:$16 sps:$4 sm:$0xff]   ;;  %v4375_v28 = vld [vmem:[%s5333_s0 + $0x54] ss:$20 sps:$4 sm:$0xff]   ;;  %v3803_v32 = vld [vmem:[%s5332_s1 + $0x1ec] ss:$16 sps:$4 sm:$0xff]  }
  0x20   :  { %1554 = vmatpush1.bf16.msra.mxu1 %v3707_v33  ;;  %1226 = vmatprep.subr.bf16.mxu0 %v3711_v35  ;;  %v3792_v30 = vld [vmem:[%s5332_s1 + $0x1c8] ss:$16 sps:$4 sm:$0xff]   ;;  %v3800_v31 = vld [vmem:[%s5332_s1 + $0x284] ss:$16 sps:$4 sm:$0xff]   ;;  %v3798_v34 = vld [vmem:[%s5332_s1 + $0x280] ss:$16 sps:$4 sm:$0xff]  }
  0x21   :  { %1555 = vmatprep.subr.bf16.mxu1 %v3715_v36  ;;  %1488 = vmatprep.mubr.bf16.mxu1 %v4032_v1  ;;  %v4396_v33 = vld [vmem:[%s5333_s0 + $0x50] ss:$20 sps:$4 sm:$0xff]   ;;  %v3801_v35 = vld [vmem:[%s5332_s1 + $0x1e8] ss:$16 sps:$4 sm:$0xff]  }
  0x22   :  { %v3806_v36 = vld [vmem:[%s5332_s1 + $0x2a4] ss:$16 sps:$4 sm:$0xff]  }
  0x23   :  { %1227 = vmatpush1.bf16.msra.mxu0 %v3716_v38  ;;  %v4416_v38 = vld [vmem:[%s5333_s0 + $0x7c] ss:$20 sps:$4 sm:$0xff]  }
  0x24   :  { %1556 = vmatpush1.bf16.msra.mxu1 %v3713_v37  ;;  %1228 = vmatprep.subr.bf16.mxu0 %v3717_v39  ;;  %v3809_v37 = vld [vmem:[%s5332_s1 + $0x20c] ss:$16 sps:$4 sm:$0xff]   ;;  %v3804_v39 = vld [vmem:[%s5332_s1 + $0x2a0] ss:$16 sps:$4 sm:$0xff]  }
  0x25   :  { %1557 = vmatprep.subr.bf16.mxu1 %v3722_v40  ;;  %v3807_v40 = vld [vmem:[%s5332_s1 + $0x208] ss:$16 sps:$4 sm:$0xff]  }
  0x27   :  { %3283 = vmatmul.mubr.msk.bf16.gmra.mrb[8].mxu1 %vm1185_vm0, %v3719_v41  ;;  %1229 = vmatpush1.bf16.msra.mxu0 %v3723_v43  ;;  %v3815_v41 = vld [vmem:[%s5332_s1 + $0x2c4] ss:$16 sps:$4 sm:$0xff]   ;;  %v4435_v43 = vld [vmem:[%s5333_s0 + $0x78] ss:$20 sps:$4 sm:$0xff]  }
  0x28   :  { %1558 = vmatpush1.bf16.msra.mxu1 %v3720_v42  ;;  %1230 = vmatprep.subr.bf16.mxu0 %v3724_v44  ;;  %v3818_v42 = vld [vmem:[%s5332_s1 + $0x22c] ss:$16 sps:$4 sm:$0xff]   ;;  %v3813_v44 = vld [vmem:[%s5332_s1 + $0x2c0] ss:$16 sps:$4 sm:$0xff]  }
  0x29   :  { %1559 = vmatprep.subr.bf16.mxu1 %v3728_v45  ;;  %1498 = vmatprep.mubr.bf16.mxu1 %v4032_v1  ;;  %v3816_v45 = vld [vmem:[%s5332_s1 + $0x228] ss:$16 sps:$4 sm:$0xff]  }
  0x2b   :  { %1231 = vmatpush1.bf16.msra.mxu0 %v3729_v47  ;;  %v3824_v47 = vld [vmem:[%s5332_s1 + $0x24c] ss:$16 sps:$4 sm:$0xff]  }
  0x2c   :  { %1560 = vmatpush1.bf16.msra.mxu1 %v3726_v46  ;;  %1232 = vmatprep.subr.bf16.mxu0 %v3730_v48  ;;  %v3821_v46 = vld [vmem:[%s5332_s1 + $0x2e4] ss:$16 sps:$4 sm:$0xff]  }
  0x2d   :  { %1561 = vmatprep.subr.bf16.mxu1 %v3735_v49  ;;  %v4454_v48 = vld [vmem:[%s5333_s0 + $0xa4] ss:$20 sps:$4 sm:$0xff]   ;;  %v3819_v49 = vld [vmem:[%s5332_s1 + $0x2e0] ss:$16 sps:$4 sm:$0xff]  }
  0x2f   :  { %3284 = vmatmul.mubr.msk.bf16.gmra.mrb[12].mxu1 %vm1185_vm0, %v3732_v50  ;;  %1233 = vmatpush1.bf16.msra.mxu0 %v3736_v52  ;;  %v3822_v50 = vld [vmem:[%s5332_s1 + $0x248] ss:$16 sps:$4 sm:$0xff]   ;;  %v3833_v52 = vld [vmem:[%s5332_s1 + $0x26c] ss:$16 sps:$4 sm:$0xff]  }
  0x30   :  { %1562 = vmatpush1.bf16.msra.mxu1 %v3733_v51  ;;  %1234 = vmatprep.subr.bf16.mxu0 %v3737_v53  ;;  %v3830_v51 = vld [vmem:[%s5332_s1 + $0x304] ss:$16 sps:$4 sm:$0xff]  }
  0x31   :  { %1563 = vmatprep.subr.bf16.mxu1 %v3741_v54  ;;  %1508 = vmatprep.mubr.bf16.mxu1 %v4032_v1  ;;  %v4473_v53 = vld [vmem:[%s5333_s0 + $0xa0] ss:$20 sps:$4 sm:$0xff]  }
  0x32   :  { %v3828_v54 = vld [vmem:[%s5332_s1 + $0x300] ss:$16 sps:$4 sm:$0xff]  }
  0x33   :  { %1235 = vmatpush1.bf16.msra.mxu0 %v3742_v56  ;;  %v3836_v56 = vld [vmem:[%s5332_s1 + $0x324] ss:$16 sps:$4 sm:$0xff]  }
  0x34   :  { %1564 = vmatpush1.bf16.msra.mxu1 %v3739_v55  ;;  %1236 = vmatprep.subr.bf16.mxu0 %v3743_v57  ;;  %v3831_v55 = vld [vmem:[%s5332_s1 + $0x268] ss:$16 sps:$4 sm:$0xff]   ;;  %v3839_v57 = vld [vmem:[%s5332_s1 + $0x28c] ss:$16 sps:$4 sm:$0xff]  }
  0x35   :  { %1565 = vmatprep.subr.bf16.mxu1 %v3748_v58  ;;  %v4492_v58 = vld [vmem:[%s5333_s0 + $0xcc] ss:$20 sps:$4 sm:$0xff]  }
  0x37   :  { %3285 = vmatmul.mubr.msk.bf16.gmra.mrb[16].mxu1 %vm1185_vm0, %v3745_v60  ;;  %1237 = vmatpush1.bf16.msra.mxu0 %v3749_v62  ;;  %v3837_v60 = vld [vmem:[%s5332_s1 + $0x288] ss:$16 sps:$4 sm:$0xff]   ;;  %v3848_v62 = vld [vmem:[%s5332_s1 + $0x2ac] ss:$16 sps:$4 sm:$0xff]  }
  0x38   :  { %1566 = vmatpush1.bf16.msra.mxu1 %v3746_v61  ;;  %1238 = vmatprep.subr.bf16.mxu0 %v3750_v63  ;;  %v3845_v61 = vld [vmem:[%s5332_s1 + $0x344] ss:$16 sps:$4 sm:$0xff]   ;;  %v4511_v63 = vld [vmem:[%s5333_s0 + $0xc8] ss:$20 sps:$4 sm:$0xff]  }
  0x39   :  { %1567 = vmatprep.subr.bf16.mxu1 %v3754_v0  ;;  %1518 = vmatprep.mubr.bf16.mxu1 %v4032_v1  ;;  %v3843_v0 = vld [vmem:[%s5332_s1 + $0x340] ss:$16 sps:$4 sm:$0xff]  }
  0x3b   :  { %1239 = vmatpush1.bf16.msra.mxu0 %v3755_v3  ;;  %v3851_v3 = vld [vmem:[%s5332_s1 + $0x364] ss:$16 sps:$4 sm:$0xff]  }
  0x3c   :  { %1568 = vmatpush1.bf16.msra.mxu1 %v3752_v2  ;;  %1240 = vmatprep.subr.bf16.mxu0 %v3756_v4  ;;  %v3846_v2 = vld [vmem:[%s5332_s1 + $0x2a8] ss:$16 sps:$4 sm:$0xff]   ;;  %v3854_v4 = vld [vmem:[%s5332_s1 + $0x2cc] ss:$16 sps:$4 sm:$0xff]  }
  0x3d   :  { %1569 = vmatprep.subr.bf16.mxu1 %v3761_v5  ;;  %v3855_v5 = vld [vmem:[%s5333_s0 + $0xf4] ss:$20 sps:$4 sm:$0xff]  }
  0x3f   :  { %3286 = vmatmul.mubr.msk.bf16.gmra.mrb[20].mxu1 %vm1185_vm0, %v3758_v6  ;;  %1241 = vmatpush1.bf16.msra.mxu0 %v3762_v8  ;;  %v3849_v6 = vld [vmem:[%s5332_s1 + $0x360] ss:$16 sps:$4 sm:$0xff]   ;;  %v3860_v8 = vld [vmem:[%s5332_s1 + $0x384] ss:$16 sps:$4 sm:$0xff]  }
  0x40   :  { %1570 = vmatpush1.bf16.msra.mxu1 %v3759_v7  ;;  %1323 = vmatprep.subr.bf16.mxu0 %v3768_v9  ;;  %v3852_v7 = vld [vmem:[%s5332_s1 + $0x2c8] ss:$16 sps:$4 sm:$0xff]   ;;  %v3863_v9 = vld [vmem:[%s5332_s1 + $0x2ec] ss:$16 sps:$4 sm:$0xff]  }
  0x41   :  { %1571 = vmatprep.subr.bf16.mxu1 %v3771_v10  ;;  %1528 = vmatprep.mubr.bf16.mxu1 %v4032_v1  ;;  %v3857_v10 = vld [vmem:[%s5333_s0 + $0xf0] ss:$20 sps:$4 sm:$0xff]  }
  0x42   :  { %1243 = vmatmul.mubr.bf16.vlgmr.msra.gmra.mrb[0].mxu0 %v4309_v11 }
  0x43   :  { %1324 = vmatpush1.bf16.msra.mxu0 %v3766_v12  ;;  %1252 = vmatprep.mubr.bf16.mxu0 %v4331_v17  ;;  %v3861_v12 = vld [vmem:[%s5332_s1 + $0x2e8] ss:$16 sps:$4 sm:$0xff]  }
  0x44   :  { %1572 = vmatpush1.bf16.msra.mxu1 %v3769_v13  ;;  %1325 = vmatprep.subr.bf16.mxu0 %v3774_v14  ;;  %v3866_v13 = vld [vmem:[%s5332_s1 + $0x3a4] ss:$16 sps:$4 sm:$0xff]   ;;  %v3869_v14 = vld [vmem:[%s5332_s1 + $0x30c] ss:$16 sps:$4 sm:$0xff]  }
  0x45   :  { %1573 = vmatprep.subr.bf16.mxu1 %v3778_v15  ;;  %v3870_v15 = vld [vmem:[%s5333_s0 + $0x11c] ss:$20 sps:$4 sm:$0xff]  }
  0x47   :  { %3287 = vmatmul.mubr.msk.bf16.gmra.mrb[24].mxu1 %vm1185_vm0, %v4337_v18  ;;  %1326 = vmatpush1.bf16.msra.mxu0 %v3772_v16  ;;  %v3864_v16 = vld [vmem:[%s5332_s1 + $0x3a0] ss:$16 sps:$4 sm:$0xff]  }
  0x48   :  { %1574 = vmatpush1.bf16.msra.mxu1 %v3776_v19  ;;  %1327 = vmatprep.subr.bf16.mxu0 %v3784_v20  ;;  %v3875_v19 = vld [vmem:[%s5332_s1 + $0x3c4] ss:$16 sps:$4 sm:$0xff]   ;;  %v3878_v20 = vld [vmem:[%s5332_s1 + $0x32c] ss:$16 sps:$4 sm:$0xff]  }
  0x49   :  { %1575 = vmatprep.subr.bf16.mxu1 %v3787_v21  ;;  %1538 = vmatprep.mubr.bf16.mxu1 %v4032_v1  ;;  %v3872_v21 = vld [vmem:[%s5333_s0 + $0x118] ss:$20 sps:$4 sm:$0xff]  }
  0x4a   :  { %1253 = vmatmul.mubr.bf16.gmra.mrb[4].mxu0 %v4352_v22 }
  0x4b   :  { %1328 = vmatpush1.bf16.msra.mxu0 %v3782_v23  ;;  %1262 = vmatprep.mubr.bf16.mxu0 %v4375_v28  ;;  %v3876_v23 = vld [vmem:[%s5332_s1 + $0x328] ss:$16 sps:$4 sm:$0xff]  }
  0x4c   :  { %1576 = vmatpush1.bf16.msra.mxu1 %v3785_v24  ;;  %1329 = vmatprep.subr.bf16.mxu0 %v3790_v25  ;;  %v3881_v24 = vld [vmem:[%s5332_s1 + $0x3e4] ss:$16 sps:$4 sm:$0xff]   ;;  %v3884_v25 = vld [vmem:[%s5332_s1 + $0x34c] ss:$16 sps:$4 sm:$0xff]  }
  0x4d   :  { %1577 = vmatprep.subr.bf16.mxu1 %v3794_v26  ;;  %v3887_v26 = vld [vmem:[%s5333_s0 + $0xc] ss:$20 sps:$4 sm:$0xff]  }
  0x4f   :  { %3288 = vmatmul.mubr.msk.bf16.gmra.mrb[28].mxu1 %vm1185_vm0, %v4381_v29  ;;  %1330 = vmatpush1.bf16.msra.mxu0 %v3788_v27  ;;  %v3879_v27 = vld [vmem:[%s5332_s1 + $0x3e0] ss:$16 sps:$4 sm:$0xff]  }
  0x50   :  { %1578 = vmatpush1.bf16.msra.mxu1 %v3792_v30  ;;  %1331 = vmatprep.subr.bf16.mxu0 %v3800_v31  ;;  %v3890_v30 = vld [vmem:[%s5332_s1 + $0x36c] ss:$16 sps:$4 sm:$0xff]  }
  0x51   :  { %1579 = vmatprep.subr.bf16.mxu1 %v3803_v32  ;;  %1581 = vmatprep.mubr.bf16.mxu1 %v4258_v59  ;;  %v3834_v59 = vld [vmem:[%s5332_s1 + $0x320] ss:$16 sps:$4 sm:$0xff]   ;;  %v3885_v31 = vld [vmem:[%s5333_s0 + $0x8] ss:$20 sps:$4 sm:$0xff]  }
  0x52   :  { %1263 = vmatmul.mubr.bf16.gmra.mrb[8].mxu0 %v4396_v33  ;;  %v3888_v32 = vld [vmem:[%s5332_s1 + $0x368] ss:$16 sps:$4 sm:$0xff]  }
  0x53   :  { %1332 = vmatpush1.bf16.msra.mxu0 %v3798_v34  ;;  %1272 = vmatprep.mubr.bf16.mxu0 %v4416_v38  ;;  %v3893_v34 = vld [vmem:[%s5332_s1 + $0x38c] ss:$16 sps:$4 sm:$0xff]  }
  0x54   :  { %1580 = vmatpush1.bf16.msra.mxu1 %v3801_v35  ;;  %1333 = vmatprep.subr.bf16.mxu0 %v3806_v36  ;;  %v3891_v35 = vld [vmem:[%s5332_s1 + $0x388] ss:$16 sps:$4 sm:$0xff]   ;;  %v3899_v36 = vld [vmem:[%s5332_s1 + $0x3ac] ss:$16 sps:$4 sm:$0xff]  }
  0x55   :  { %1662 = vmatprep.subr.bf16.mxu1 %v3809_v37  ;;  %v3896_v37 = vld [vmem:[%s5333_s0 + $0x30] ss:$20 sps:$4 sm:$0xff]  }
  0x57   :  { %1582 = vmatmul.mubr.bf16.vlgmr.msra.gmra.mrb[32].mxu1 %v4309_v11  ;;  %1334 = vmatpush1.bf16.msra.mxu0 %v3804_v39  ;;  %v3858_v11 = vld [vmem:[%s5332_s1 + $0x380] ss:$16 sps:$4 sm:$0xff]  }
  0x58   :  { %1663 = vmatpush1.bf16.msra.mxu1 %v3807_v40  ;;  %1335 = vmatprep.subr.bf16.mxu0 %v3815_v41  ;;  %v3903_v39 = vld [vmem:[%s5333_s0 + $0x5c] ss:$20 sps:$4 sm:$0xff]   ;;  %v3900_v41 = vld [vmem:[%s5332_s1 + $0x3c8] ss:$16 sps:$4 sm:$0xff]  }
  0x59   :  { %1664 = vmatprep.subr.bf16.mxu1 %v3818_v42  ;;  %1591 = vmatprep.mubr.bf16.mxu1 %v4331_v17  ;;  %v3867_v17 = vld [vmem:[%s5332_s1 + $0x308] ss:$16 sps:$4 sm:$0xff]   ;;  %v3902_v40 = vld [vmem:[%s5332_s1 + $0x3cc] ss:$16 sps:$4 sm:$0xff]  }
  0x5a   :  { %1273 = vmatmul.mubr.bf16.gmra.mrb[12].mxu0 %v4435_v43  ;;  %v3908_v42 = vld [vmem:[%s5332_s1 + $0x3ec] ss:$16 sps:$4 sm:$0xff]  }
  0x5b   :  { %1336 = vmatpush1.bf16.msra.mxu0 %v3813_v44  ;;  %1282 = vmatprep.mubr.bf16.mxu0 %v4454_v48  ;;  %v3906_v44 = vld [vmem:[%s5332_s1 + $0x3e8] ss:$16 sps:$4 sm:$0xff]  }
  0x5c   :  { %1665 = vmatpush1.bf16.msra.mxu1 %v3816_v45  ;;  %1337 = vmatprep.subr.bf16.mxu0 %v3821_v46  ;;  %v3912_v45 = vld [vmem:[%s5333_s0 + $0x84] ss:$20 sps:$4 sm:$0xff]   ;;  %v3911_v46 = vld [vmem:[%s5332_s1 + $0x40c] ss:$16 sps:$4 sm:$0xff]  }
  0x5d   :  { %1666 = vmatprep.subr.bf16.mxu1 %v3824_v47  ;;  %v3909_v47 = vld [vmem:[%s5332_s1 + $0x408] ss:$16 sps:$4 sm:$0xff]  }
  0x5f   :  { %1592 = vmatmul.mubr.bf16.gmra.mrb[36].mxu1 %v4352_v22  ;;  %1338 = vmatpush1.bf16.msra.mxu0 %v3819_v49  ;;  %v3873_v22 = vld [vmem:[%s5332_s1 + $0x3c0] ss:$16 sps:$4 sm:$0xff]  }
  0x60   :  { %1667 = vmatpush1.bf16.msra.mxu1 %v3822_v50  ;;  %1339 = vmatprep.subr.bf16.mxu0 %v3830_v51  ;;  %v3914_v49 = vld [vmem:[%s5333_s0 + $0x80] ss:$20 sps:$4 sm:$0xff]   ;;  %v3918_v51 = vld [vmem:[%s5332_s1 + $0x428] ss:$16 sps:$4 sm:$0xff]  }
  0x61   :  { %1668 = vmatprep.subr.bf16.mxu1 %v3833_v52  ;;  %1601 = vmatprep.mubr.bf16.mxu1 %v4375_v28  ;;  %v3882_v28 = vld [vmem:[%s5332_s1 + $0x348] ss:$16 sps:$4 sm:$0xff]   ;;  %v3915_v50 = vld [vmem:[%s5333_s0 + $0xac] ss:$20 sps:$4 sm:$0xff]  }
  0x62   :  { %1283 = vmatmul.mubr.bf16.gmra.mrb[16].mxu0 %v4473_v53  ;;  %v3926_v52 = vld [vmem:[%s5332_s1 + $0x44c] ss:$16 sps:$4 sm:$0xff]  }
  0x63   :  { %1340 = vmatpush1.bf16.msra.mxu0 %v3828_v54  ;;  %1292 = vmatprep.mubr.bf16.mxu0 %v4492_v58  ;;  %v3935_v54 = vld [vmem:[%s5332_s1 + $0x46c] ss:$16 sps:$4 sm:$0xff]  }
  0x64   :  { %1669 = vmatpush1.bf16.msra.mxu1 %v3831_v55  ;;  %1341 = vmatprep.subr.bf16.mxu0 %v3836_v56  ;;  %v3917_v55 = vld [vmem:[%s5333_s0 + $0xa8] ss:$20 sps:$4 sm:$0xff]  }
  0x65   :  { %1670 = vmatprep.subr.bf16.mxu1 %v3839_v57  ;;  %v3921_v56 = vld [vmem:[%s5333_s0 + $0xd4] ss:$20 sps:$4 sm:$0xff]  }
  0x66   :  { %v3933_v57 = vld [vmem:[%s5332_s1 + $0x468] ss:$16 sps:$4 sm:$0xff]  }
  0x67   :  { %1602 = vmatmul.mubr.bf16.gmra.mrb[40].mxu1 %v4396_v33  ;;  %1342 = vmatpush1.bf16.msra.mxu0 %v3834_v59  ;;  %v3894_v33 = vld [vmem:[%s5333_s0 + $0x34] ss:$20 sps:$4 sm:$0xff]  }
  0x68   :  { %1671 = vmatpush1.bf16.msra.mxu1 %v3837_v60  ;;  %1343 = vmatprep.subr.bf16.mxu0 %v3845_v61  ;;  %v3936_v59 = vld [vmem:[%s5332_s1 + $0x488] ss:$16 sps:$4 sm:$0xff]   ;;  %v3941_v60 = vld [vmem:[%s5334_s3 + $0x4] ss:$8 sps:$4 sm:$0xff]  }
  0x69   :  { %1672 = vmatprep.subr.bf16.mxu1 %v3848_v62  ;;  %1611 = vmatprep.mubr.bf16.mxu1 %v4416_v38  ;;  %v3897_v38 = vld [vmem:[%s5332_s1 + $0x3a8] ss:$16 sps:$4 sm:$0xff]   ;;  %v3944_v62 = vld [vmem:[%s5334_s3 + $0x14] ss:$8 sps:$4 sm:$0xff]  }
  0x6a   :  { %1293 = vmatmul.mubr.bf16.gmra.mrb[20].mxu0 %v4511_v63  ;;  %v3939_v61 = vld [vmem:[%s5334_s3] ss:$8 sps:$4 sm:$0xff]  }
  0x6b   :  { %1344 = vmatpush1.bf16.msra.mxu0 %v3843_v0  ;;  %1302 = vmatprep.mubr.bf16.mxu0 %v3855_v5  ;;  %v3942_v0 = vld [vmem:[%s5334_s3 + $0x10] ss:$8 sps:$4 sm:$0xff]  }
  0x6c   :  { %1673 = vmatpush1.bf16.msra.mxu1 %v3846_v2  ;;  %1345 = vmatprep.subr.bf16.mxu0 %v3851_v3  ;;  %v3947_v2 = vld [vmem:[%s5334_s3 + $0x24] ss:$8 sps:$4 sm:$0xff]   ;;  %v3927_v3 = vld [vmem:[%s5333_s0 + $0xfc] ss:$20 sps:$4 sm:$0xff]  }
  0x6d   :  { %1674 = vmatprep.subr.bf16.mxu1 %v3854_v4  ;;  %v3945_v4 = vld [vmem:[%s5334_s3 + $0x20] ss:$8 sps:$4 sm:$0xff]  }
  0x6f   :  { %1612 = vmatmul.mubr.bf16.gmra.mrb[44].mxu1 %v4435_v43  ;;  %1346 = vmatpush1.bf16.msra.mxu0 %v3849_v6  ;;  %v3905_v43 = vld [vmem:[%s5333_s0 + $0x58] ss:$20 sps:$4 sm:$0xff]  }
  0x70   :  { %1675 = vmatpush1.bf16.msra.mxu1 %v3852_v7  ;;  %1347 = vmatprep.subr.bf16.mxu0 %v3860_v8  ;;  %v3929_v6 = vld [vmem:[%s5333_s0 + $0xf8] ss:$20 sps:$4 sm:$0xff]  }
  0x71   :  { %1676 = vmatprep.subr.bf16.mxu1 %v3863_v9  ;;  %1621 = vmatprep.mubr.bf16.mxu1 %v4454_v48  ;;  %v3920_v48 = vld [vmem:[%s5332_s1 + $0x42c] ss:$16 sps:$4 sm:$0xff]   ;;  %v3948_v7 = vld [vmem:[%s5334_s3 + $0x30] ss:$8 sps:$4 sm:$0xff]  }
  0x72   :  { %1303 = vmatmul.mubr.bf16.gmra.mrb[24].mxu0 %v3857_v10  ;;  %v3953_v8 = vld [vmem:[%s5334_s3 + $0x44] ss:$8 sps:$4 sm:$0xff]  }
  0x73   :  { %1348 = vmatpush1.bf16.msra.mxu0 %v3858_v11  ;;  %1312 = vmatprep.mubr.bf16.mxu0 %v3870_v15  ;;  %v3930_v9 = vld [vmem:[%s5333_s0 + $0x124] ss:$20 sps:$4 sm:$0xff]   ;;  %v3956_v11 = vld [vmem:[%s5334_s3 + $0x54] ss:$8 sps:$4 sm:$0xff]  }
  0x74   :  { %1677 = vmatpush1.bf16.msra.mxu1 %v3861_v12  ;;  %1349 = vmatprep.subr.bf16.mxu0 %v3866_v13  ;;  %v3954_v12 = vld [vmem:[%s5334_s3 + $0x50] ss:$8 sps:$4 sm:$0xff]   ;;  %v3932_v13 = vld [vmem:[%s5333_s0 + $0x120] ss:$20 sps:$4 sm:$0xff]  }
  0x75   :  { %1678 = vmatprep.subr.bf16.mxu1 %v3869_v14  ;;  %v3959_v14 = vld [vmem:[%s5334_s3 + $0x64] ss:$8 sps:$4 sm:$0xff]  }
  0x77   :  { %1622 = vmatmul.mubr.bf16.gmra.mrb[48].mxu1 %v4473_v53  ;;  %1350 = vmatpush1.bf16.msra.mxu0 %v3864_v16  ;;  %v3924_v53 = vld [vmem:[%s5332_s1 + $0x448] ss:$16 sps:$4 sm:$0xff]   ;;  %v3962_v16 = vld [vmem:[%s5334_s3 + $0x74] ss:$8 sps:$4 sm:$0xff]  }
  0x78   :  { %1679 = vmatpush1.bf16.msra.mxu1 %v3867_v17  ;;  %1351 = vmatprep.subr.bf16.mxu0 %v3875_v19  ;;  %v3960_v17 = vld [vmem:[%s5334_s3 + $0x70] ss:$8 sps:$4 sm:$0xff]   ;;  %v3965_v19 = vld [vmem:[%s5334_s3 + $0x84] ss:$8 sps:$4 sm:$0xff]  }
  0x79   :  { %1680 = vmatprep.subr.bf16.mxu1 %v3878_v20  ;;  %1631 = vmatprep.mubr.bf16.mxu1 %v4492_v58  ;;  %v3938_v58 = vld [vmem:[%s5332_s1 + $0x48c] ss:$16 sps:$4 sm:$0xff]   ;;  %v3963_v20 = vld [vmem:[%s5334_s3 + $0x80] ss:$8 sps:$4 sm:$0xff]  }
  0x7a   :  { %1313 = vmatmul.mubr.bf16.gmra.mrb[28].mxu0 %v3872_v21 }
  0x7b   :  { %1352 = vmatpush1.bf16.msra.mxu0 %v3873_v22  ;;  %1355 = vmatprep.mubr.bf16.mxu0 %v3887_v26  ;;  %v3966_v22 = vld [vmem:[%s5334_s3 + $0x90] ss:$8 sps:$4 sm:$0xff]  }
  0x7c   :  { %1681 = vmatpush1.bf16.msra.mxu1 %v3876_v23  ;;  %1353 = vmatprep.subr.bf16.mxu0 %v3881_v24  ;;  %v3971_v23 = vld [vmem:[%s5334_s3 + $0xa4] ss:$8 sps:$4 sm:$0xff]   ;;  %v3969_v24 = vld [vmem:[%s5334_s3 + $0xa0] ss:$8 sps:$4 sm:$0xff]  }
  0x7d   :  { %1682 = vmatprep.subr.bf16.mxu1 %v3884_v25  ;;  %v3974_v25 = vld [vmem:[%s5334_s3 + $0xb4] ss:$8 sps:$4 sm:$0xff]  }
  0x7f   :  { %1632 = vmatmul.mubr.bf16.gmra.mrb[52].mxu1 %v4511_v63  ;;  %1354 = vmatpush1.bf16.msra.mxu0 %v3879_v27  ;;  %v3923_v63 = vld [vmem:[%s5333_s0 + $0xd0] ss:$20 sps:$4 sm:$0xff]  }
  0x80   :  { %1683 = vmatpush1.bf16.msra.mxu1 %v3882_v28  ;;  %1641 = vmatprep.mubr.bf16.mxu1 %v3855_v5  ;;  %v3950_v5 = vld [vmem:[%s5334_s3 + $0x34] ss:$8 sps:$4 sm:$0xff]   ;;  %v3977_v27 = vld [vmem:[%s5334_s3 + $0xc4] ss:$8 sps:$4 sm:$0xff]   ;;  %v3975_v28 = vld [vmem:[%s5334_s3 + $0xc0] ss:$8 sps:$4 sm:$0xff]  }
  0x81   :  { %1684 = vmatprep.subr.bf16.mxu1 %v3890_v30  ;;  %2450 = vmatprep.subr.bf16.mxu0 %v3941_v60  ;;  %v3980_v30 = vld [vmem:[%s5334_s3 + $0xd4] ss:$8 sps:$4 sm:$0xff]  }
  0x82   :  { %1356 = vmatmul.mubr.bf16.vlgmr.msra.gmra.mrb[0].mxu0 %v3885_v31 }
  0x83   :  { %1365 = vmatprep.mubr.bf16.mxu0 %v3894_v33  ;;  %2451 = vmatpush1.bf16.msra.mxu0 %v3939_v61 }
  0x84   :  { %1685 = vmatpush1.bf16.msra.mxu1 %v3888_v32  ;;  %2452 = vmatprep.subr.bf16.mxu0 %v3944_v62  ;;  %v3978_v32 = vld [vmem:[%s5334_s3 + $0xd0] ss:$8 sps:$4 sm:$0xff]  }
  0x85   :  { %1686 = vmatprep.subr.bf16.mxu1 %v3893_v34  ;;  %v3981_v34 = vld [vmem:[%s5334_s3 + $0xe0] ss:$8 sps:$4 sm:$0xff]  }
  0x87   :  { %1642 = vmatmul.mubr.bf16.gmra.mrb[56].mxu1 %v3857_v10  ;;  %2453 = vmatpush1.bf16.msra.mxu0 %v3942_v0  ;;  %v3951_v10 = vld [vmem:[%s5334_s3 + $0x40] ss:$8 sps:$4 sm:$0xff]  }
  0x88   :  { %1687 = vmatpush1.bf16.msra.mxu1 %v3891_v35  ;;  %1651 = vmatprep.mubr.bf16.mxu1 %v3870_v15  ;;  %v3957_v15 = vld [vmem:[%s5334_s3 + $0x60] ss:$8 sps:$4 sm:$0xff]   ;;  %v3986_v35 = vld [vmem:[%s5334_s3 + $0xf4] ss:$8 sps:$4 sm:$0xff]  }
  0x89   :  { %1688 = vmatprep.subr.bf16.mxu1 %v3899_v36  ;;  %2454 = vmatprep.subr.bf16.mxu0 %v3947_v2  ;;  %v4027_v36 = vld [vmem:[%s5333_s0 + $0x38] ss:$20 sps:$4 sm:$0xff]  }
  0x8a   :  { %1366 = vmatmul.mubr.bf16.gmra.mrb[4].mxu0 %v3896_v37 }
  0x8b   :  { %1375 = vmatprep.mubr.bf16.mxu0 %v3903_v39  ;;  %2455 = vmatpush1.bf16.msra.mxu0 %v3945_v4 }
  0x8c   :  { %1689 = vmatpush1.bf16.msra.mxu1 %v3897_v38  ;;  %2456 = vmatprep.subr.bf16.mxu0 %v3950_v5  ;;  %v4028_v38 = vld [vmem:[%s5333_s0 + $0x60] ss:$20 sps:$4 sm:$0xff]  }
  0x8d   :  { %1690 = vmatprep.subr.bf16.mxu1 %v3902_v40 }
  0x8f   :  { %1652 = vmatmul.mubr.bf16.gmra.mrb[60].mxu1 %v3872_v21  ;;  %2457 = vmatpush1.bf16.msra.mxu0 %v3948_v7  ;;  %v3968_v21 = vld [vmem:[%s5334_s3 + $0x94] ss:$8 sps:$4 sm:$0xff]  }
  0x90   :  { %1691 = vmatpush1.bf16.msra.mxu1 %v3900_v41  ;;  %1694 = vmatprep.mubr.bf16.mxu1 %v3887_v26  ;;  %v3972_v26 = vld [vmem:[%s5334_s3 + $0xb0] ss:$8 sps:$4 sm:$0xff]  }
  0x91   :  { %1692 = vmatprep.subr.bf16.mxu1 %v3908_v42  ;;  %2458 = vmatprep.subr.bf16.mxu0 %v3953_v8 }
  0x92   :  { %1376 = vmatmul.mubr.bf16.gmra.mrb[8].mxu0 %v3905_v43 }
  0x93   :  { %1385 = vmatprep.mubr.bf16.mxu0 %v3912_v45  ;;  %2459 = vmatpush1.bf16.msra.mxu0 %v3951_v10  ;;  %v225_v10 = vlaneseq }
  0x94   :  { %1693 = vmatpush1.bf16.msra.mxu1 %v3906_v44  ;;  %2460 = vmatprep.subr.bf16.mxu0 %v3956_v11 }
  0x95   :  { %1775 = vmatprep.subr.bf16.mxu1 %v3911_v46  ;;  %v4903_v11 = vshrl.u32 %v225_v10, 7 }
  0x97   :  { %1695 = vmatmul.mubr.bf16.vlgmr.msra.gmra.mrb[32].mxu1 %v3885_v31  ;;  %2461 = vmatpush1.bf16.msra.mxu0 %v3954_v12  ;;  %v4026_v31 = vld [vmem:[%s5333_s0 + $0x10] ss:$20 sps:$4 sm:$0xff]   ;;  %v227_v12 = vsub.s32 0, %v4903_v11 }
  0x98   :  { %1776 = vmatpush1.bf16.msra.mxu1 %v3909_v47  ;;  %1704 = vmatprep.mubr.bf16.mxu1 %v3894_v33  ;;  %v3983_v33 = vld [vmem:[%s5334_s3 + $0xe4] ss:$8 sps:$4 sm:$0xff]  }
  0x99   :  { %1777 = vmatprep.subr.bf16.mxu1 %v3920_v48  ;;  %2462 = vmatprep.subr.bf16.mxu0 %v3959_v14  ;;  %v4030_v48 = vld [vmem:[%s5333_s0 + $0xb0] ss:$20 sps:$4 sm:$0xff]   ;;  %v231_v14 = vsub.s32 1, %v4903_v11 }
  0x9a   :  { %1386 = vmatmul.mubr.bf16.gmra.mrb[12].mxu0 %v3914_v49 }
  0x9b   :  { %1395 = vmatprep.mubr.bf16.mxu0 %v3915_v50  ;;  %2463 = vmatpush1.bf16.msra.mxu0 %v3957_v15 }
  0x9c   :  { %1778 = vmatpush1.bf16.msra.mxu1 %v3918_v51  ;;  %2464 = vmatprep.subr.bf16.mxu0 %v3962_v16  ;;  %v3989_v51 = vld [vmem:[%s5334_s3 + $0x104] ss:$8 sps:$4 sm:$0xff]  }
  0x9d   :  { %1779 = vmatprep.subr.bf16.mxu1 %v3926_v52 }
  0x9f   :  { %1705 = vmatmul.mubr.bf16.gmra.mrb[36].mxu1 %v3896_v37  ;;  %2465 = vmatpush1.bf16.msra.mxu0 %v3960_v17  ;;  %v3984_v37 = vld [vmem:[%s5334_s3 + $0xf0] ss:$8 sps:$4 sm:$0xff]  }
  0xa0   :  { %1714 = vmatprep.mubr.bf16.mxu1 %v3903_v39  ;;  %1780 = vmatpush1.bf16.msra.mxu1 %v3924_v53 }
  0xa1   :  { %1781 = vmatprep.subr.bf16.mxu1 %v3935_v54  ;;  %2466 = vmatprep.subr.bf16.mxu0 %v3965_v19  ;;  %v4031_v54 = vld [vmem:[%s5333_s0 + $0xd8] ss:$20 sps:$4 sm:$0xff]  }
  0xa2   :  { %1396 = vmatmul.mubr.bf16.gmra.mrb[16].mxu0 %v3917_v55 }
  0xa3   :  { %1405 = vmatprep.mubr.bf16.mxu0 %v3921_v56  ;;  %2467 = vmatpush1.bf16.msra.mxu0 %v3963_v20 }
  0xa4   :  { %1782 = vmatpush1.bf16.msra.mxu1 %v3933_v57  ;;  %2468 = vmatprep.subr.bf16.mxu0 %v3968_v21 }
  0xa5   :  { %1783 = vmatprep.subr.bf16.mxu1 %v3938_v58 }
  0xa7   :  { %1715 = vmatmul.mubr.bf16.gmra.mrb[40].mxu1 %v3905_v43  ;;  %2469 = vmatpush1.bf16.msra.mxu0 %v3966_v22  ;;  %v4029_v43 = vld [vmem:[%s5333_s0 + $0x88] ss:$20 sps:$4 sm:$0xff]  }
  0xa8   :  { %1724 = vmatprep.mubr.bf16.mxu1 %v3912_v45  ;;  %1784 = vmatpush1.bf16.msra.mxu1 %v3936_v59 }
  0xa9   :  { %3378 = vmatprep.subr.bf16.mxu1 %v4032_v1  ;;  %2470 = vmatprep.subr.bf16.mxu0 %v3971_v23 }
  0xaa   :  { %1406 = vmatmul.mubr.bf16.gmra.mrb[20].mxu0 %v3923_v63 }
  0xab   :  { %1415 = vmatprep.mubr.bf16.mxu0 %v3927_v3  ;;  %2471 = vmatpush1.bf16.msra.mxu0 %v3969_v24 }
  0xac   :  { %2472 = vmatprep.subr.bf16.mxu0 %v3974_v25 }
  0xaf   :  { %1725 = vmatmul.mubr.bf16.gmra.mrb[44].mxu1 %v3914_v49  ;;  %2473 = vmatpush1.bf16.msra.mxu0 %v3972_v26 }
  0xb0   :  { %1734 = vmatprep.mubr.bf16.mxu1 %v3915_v50  ;;  %2474 = vmatprep.subr.bf16.mxu0 %v3977_v27 }
  0xb2   :  { %1416 = vmatmul.mubr.bf16.gmra.mrb[24].mxu0 %v3929_v6 }
  0xb3   :  { %1425 = vmatprep.mubr.bf16.mxu0 %v3930_v9  ;;  %2475 = vmatpush1.bf16.msra.mxu0 %v3975_v28 }
  0xb4   :  { %2476 = vmatprep.subr.bf16.mxu0 %v3980_v30 }
  0xb7   :  { %1735 = vmatmul.mubr.bf16.gmra.mrb[48].mxu1 %v3917_v55  ;;  %2477 = vmatpush1.bf16.msra.mxu0 %v3978_v32 }
  0xb8   :  { %1744 = vmatprep.mubr.bf16.mxu1 %v3921_v56  ;;  %2478 = vmatprep.subr.bf16.mxu0 %v3983_v33 }
  0xba   :  { %1426 = vmatmul.mubr.bf16.gmra.mrb[28].mxu0 %v3932_v13 }
  0xbb   :  { %2479 = vmatpush1.bf16.msra.mxu0 %v3981_v34 }
  0xbc   :  { %2480 = vmatprep.subr.bf16.mxu0 %v3986_v35 }
  0xbf   :  { %1745 = vmatmul.mubr.bf16.gmra.mrb[52].mxu1 %v3923_v63  ;;  %2481 = vmatpush1.bf16.msra.mxu0 %v3984_v37 }
  0xc0   :  { %1754 = vmatprep.mubr.bf16.mxu1 %v3927_v3  ;;  %2563 = vmatprep.subr.bf16.mxu0 %v3989_v51 }
  0xc7   :  { %1755 = vmatmul.mubr.bf16.gmra.mrb[56].mxu1 %v3929_v6 }
  0xc8   :  { %1764 = vmatprep.mubr.bf16.mxu1 %v3930_v9 }
  0xcf   :  { %1765 = vmatmul.mubr.bf16.gmra.mrb[60].mxu1 %v3932_v13  ;;  %v4909_v13 = vld [vmem:[%s5335_s2] sm:$0xf] }
  0xd0   :  { %1807 = vmatprep.mubr.bf16.mxu1 %v4032_v1  ;;  %v4915_v15 = vrot.slane %v4909_v13, %v227_v12  ;;  %v4920_v16 = vrot.slane %v4909_v13, %v231_v14 }
  0xd7   :  { %3289 = vmatmul.mubr.msk.bf16.vlgmr.msra.gmra.mrb[32].mxu1 %vm1185_vm0, %v4026_v31 }
  0xd8   :  { %1817 = vmatprep.mubr.bf16.mxu1 %v4032_v1 }
  0xdf   :  { %3290 = vmatmul.mubr.msk.bf16.gmra.mrb[36].mxu1 %vm1185_vm0, %v4027_v36 }
  0xe0   :  { %1827 = vmatprep.mubr.bf16.mxu1 %v4032_v1 }
  0xe7   :  { %3291 = vmatmul.mubr.msk.bf16.gmra.mrb[40].mxu1 %vm1185_vm0, %v4028_v38 }
  0xe8   :  { %1837 = vmatprep.mubr.bf16.mxu1 %v4032_v1 }
  0xea   :  { %v1470_v39 = vpop.f32.mrb[0].mxu1 }
  0xeb   :  { %v1472_v40 = vpop.f32.mrb[1].mxu1 }
  0xec   :  { %v4820_v41 = vpop.f32.mrb[2].mxu1 }
  0xed   :  { %v4822_v42 = vpop.f32.mrb[3].mxu1 }
  0xef   :  { %3292 = vmatmul.mubr.msk.bf16.gmra.mrb[44].mxu1 %vm1185_vm0, %v4029_v43 }
  0xf0   :  { %1847 = vmatprep.mubr.bf16.mxu1 %v4032_v1 }
  0xf2   :  { %v4829_v44 = vpop.f32.mrb[4].mxu1 }
  0xf3   :  { %v4831_v45 = vpop.f32.mrb[5].mxu1 }
  0xf4   :  { %v4833_v46 = vpop.f32.mrb[6].mxu1 }
  0xf5   :  { %v4835_v47 = vpop.f32.mrb[7].mxu1 }
  0xf7   :  { %3293 = vmatmul.mubr.msk.bf16.gmra.mrb[48].mxu1 %vm1185_vm0, %v4030_v48 }
  0xf8   :  { %1857 = vmatprep.mubr.bf16.mxu1 %v4032_v1 }
  0xfa   :  { %v4842_v49 = vpop.f32.mrb[8].mxu1 }
  0xfb   :  { %v4844_v50 = vpop.f32.mrb[9].mxu1 }
  0xfc   :  { %v4849_v52 = vpop.f32.mrb[10].mxu1 }
  0xfd   :  { %v4851_v53 = vpop.f32.mrb[11].mxu1 }
  0xff   :  { %3294 = vmatmul.mubr.msk.bf16.gmra.mrb[52].mxu1 %vm1185_vm0, %v4031_v54 }
 0x100   :  { %1867 = vmatprep.mubr.bf16.mxu1 %v4032_v1 }
 0x102   :  { %v4858_v55 = vpop.f32.mrb[12].mxu1 }
 0x103   :  { %v4860_v56 = vpop.f32.mrb[13].mxu1 }
 0x104   :  { %v4862_v57 = vpop.f32.mrb[14].mxu1 }
 0x105   :  { %v4864_v58 = vpop.f32.mrb[15].mxu1 }
 0x107   :  { %3295 = vmatmul.mubr.msk.bf16.gmra.mrb[56].mxu1 %vm1185_vm0, %v4337_v18 }
 0x108   :  { %1877 = vmatprep.mubr.bf16.mxu1 %v4032_v1 }
 0x10a   :  { %v4869_v59 = vpop.f32.mrb[16].mxu1 }
 0x10b   :  { %v4871_v60 = vpop.f32.mrb[17].mxu1 }
 0x10c   :  { %v4873_v61 = vpop.f32.mrb[18].mxu1 }
 0x10d   :  { %v4875_v62 = vpop.f32.mrb[19].mxu1 }
 0x10f   :  { %3296 = vmatmul.mubr.msk.bf16.gmra.mrb[60].mxu1 %vm1185_vm0, %v4381_v29 }
 0x112   :  { %v4879_v63 = vpop.f32.mrb[20].mxu1 }
 0x113   :  { %v4881_v0 = vpop.f32.mrb[21].mxu1 }
 0x114   :  { %v4883_v2 = vpop.f32.mrb[22].mxu1 }
 0x115   :  { %v4885_v18 = vpop.f32.mrb[23].mxu1 }
 0x11a   :  { %v4887_v3 = vpop.f32.mrb[24].mxu1 }
 0x11b   :  { %v4889_v4 = vpop.f32.mrb[25].mxu1 }
 0x11c   :  { %v4891_v5 = vpop.f32.mrb[26].mxu1 }
 0x11d   :  { %v4893_v6 = vpop.f32.mrb[27].mxu1 }
 0x122   :  { %v4895_v7 = vpop.f32.mrb[28].mxu1 }
 0x123   :  { %v4897_v8 = vpop.f32.mrb[29].mxu1 }
 0x124   :  { %v4899_v29 = vpop.f32.mrb[30].mxu1 }
 0x125   :  { %v4901_v9 = vpop.f32.mrb[31].mxu1 }
 0x155   :  { %v1357_v17 = vpop.f32.mrb[0].mxu0 }
 0x156   :  { %v3404_v19 = vadd.f32 %v1357_v17, %v4915_v15  ;;  %v1359_v20 = vpop.f32.mrb[1].mxu0 }
 0x157   :  { %v3406_v21 = vadd.f32 %v1359_v20, %v4920_v16  ;;  %v1361_v22 = vpop.f32.mrb[2].mxu0 }
 0x158   :  { %v3405_v23 = vadd.f32 %v3404_v19, %v1470_v39  ;;  %v3408_v24 = vadd.f32 %v1361_v22, %v4915_v15  ;;  %v1363_v25 = vpop.f32.mrb[3].mxu0  ;;  %v3987_v19 = vld [vmem:[%s5334_s3 + $0x100] ss:$8 sps:$4 sm:$0xff]   ;;  %v3992_v22 = vld [vmem:[%s5334_s3 + $0x114] ss:$8 sps:$4 sm:$0xff]  }
 0x159   :  { %v3407_v26 = vadd.f32 %v3406_v21, %v1472_v40  ;;  %v3410_v27 = vadd.f32 %v1363_v25, %v4920_v16 }
 0x15a   :  { %v1952_v28 = vmul.f32 0.2, %v3405_v23  ;;  %v3409_v30 = vadd.f32 %v3408_v24, %v4820_v41  ;;  %vm1888_vm1 = vcmp.ge.f32.partialorder %v3405_v23, 0.0 }
 0x15b   :  { %v1953_v31 = vmul.f32 0.2, %v3407_v26  ;;  %v3411_v32 = vadd.f32 %v3410_v27, %v4822_v42  ;;  %vm1889_vm2 = vcmp.ge.f32.partialorder %v3407_v26, 0.0 }
 0x15c   :  { %vm1892_vm3 = vcmp.ge.f32.partialorder %v3409_v30, 0.0  ;;  %v1956_v33 = vmul.f32 0.2, %v3409_v30  ;;  %v2016_v36 = vsel %vm1888_vm1, %v3405_v23, %v1952_v28 }
 0x15d   :  { %vm1893_vm4 = vcmp.ge.f32.partialorder %v3411_v32, 0.0  ;;  %v1957_v34 = vmul.f32 0.2, %v3411_v32  ;;  %v1367_v35 = vpop.f32.mrb[4].mxu0  ;;  %v2017_v41 = vsel %vm1889_vm2, %v3407_v26, %v1953_v31  ;;  %vm2443_vm2 = vcmask 1042432  }
 0x15e   :  { %v2020_v37 = vsel %vm1892_vm3, %v3409_v30, %v1956_v33  ;;  %v3412_v38 = vadd.f32 %v1367_v35, %v4915_v15  ;;  %v1369_v39 = vpop.f32.mrb[5].mxu0 }
 0x15f   :  { %v2080_v40 = vpack.c.bf16 %v2020_v37, %v2016_v36  ;;  %v3414_v43 = vadd.f32 %v1369_v39, %v4920_v16  ;;  %v1371_v48 = vpop.f32.mrb[6].mxu0  ;;  %v2021_v51 = vsel %vm1893_vm4, %v3411_v32, %v1957_v34 }
 0x160   :  { %v3413_v54 = vadd.f32 %v3412_v38, %v4829_v44  ;;  %v3416_v42 = vadd.f32 %v1371_v48, %v4915_v15  ;;  %v1373_v10 = vpop.f32.mrb[7].mxu0  ;;  %v2081_v17 = vpack.c.bf16 %v2021_v51, %v2017_v41  ;;  %v3993_v48 = vld [vmem:[%s5334_s3 + $0x120] ss:$8 sps:$4 sm:$0xff]  }
 0x161   :  { %v3415_v20 = vadd.f32 %v3414_v43, %v4831_v45  ;;  %v3418_v21 = vadd.f32 %v1373_v10, %v4920_v16  ;;  %v3990_v45 = vld [vmem:[%s5334_s3 + $0x110] ss:$8 sps:$4 sm:$0xff]  }
 0x162   :  { %v1960_v23 = vmul.f32 0.2, %v3413_v54  ;;  %v3417_v24 = vadd.f32 %v3416_v42, %v4833_v46  ;;  %2482 = vmatprep.mubr.bf16.mxu0 %v2081_v17  ;;  %vm1896_vm5 = vcmp.ge.f32.partialorder %v3413_v54, 0.0  ;;  %v3995_v46 = vld [vmem:[%s5334_s3 + $0x124] ss:$8 sps:$4 sm:$0xff]  }
 0x163   :  { %v1961_v44 = vmul.f32 0.2, %v3415_v20  ;;  %v3419_v25 = vadd.f32 %v3418_v21, %v4835_v47  ;;  %2483 = vmatmul.mubr.bf16.vlgmr.msra.gmra.mrb[32].mxu0 %v2080_v40  ;;  %vm1897_vm6 = vcmp.ge.f32.partialorder %v3415_v20, 0.0 }
 0x164   :  { %vm1900_vm7 = vcmp.ge.f32.partialorder %v3417_v24, 0.0  ;;  %v1964_v26 = vmul.f32 0.2, %v3417_v24  ;;  %2564 = vmatpush1.bf16.msra.mxu0 %v3987_v19  ;;  %v2024_v31 = vsel %vm1896_vm5, %v3413_v54, %v1960_v23  ;;  %v3998_v54 = vld [vmem:[%s5334_s3 + $0x134] ss:$8 sps:$4 sm:$0xff]  }
 0x165   :  { %vm1901_vm8 = vcmp.ge.f32.partialorder %v3419_v25, 0.0  ;;  %v1965_v27 = vmul.f32 0.2, %v3419_v25  ;;  %v1377_v28 = vpop.f32.mrb[8].mxu0  ;;  %2565 = vmatprep.subr.bf16.mxu0 %v3992_v22  ;;  %v2025_v35 = vsel %vm1897_vm6, %v3415_v20, %v1961_v44  ;;  %v3999_v44 = vld [vmem:[%s5334_s3 + $0x140] ss:$8 sps:$4 sm:$0xff]  }
 0x166   :  { %v3420_v30 = vadd.f32 %v1377_v28, %v4915_v15  ;;  %v1379_v47 = vpop.f32.mrb[9].mxu0  ;;  %v2028_v32 = vsel %vm1900_vm7, %v3417_v24, %v1964_v26 }
 0x167   :  { %v3422_v33 = vadd.f32 %v1379_v47, %v4920_v16  ;;  %v1381_v34 = vpop.f32.mrb[10].mxu0  ;;  %v2029_v36 = vsel %vm1901_vm8, %v3419_v25, %v1965_v27  ;;  %v2084_v37 = vpack.c.bf16 %v2028_v32, %v2024_v31  ;;  %v4978_v25 = vld [vmem:[%s5336_s5] sm:$0xff]  }
 0x168   :  { %v3421_v38 = vadd.f32 %v3420_v30, %v4842_v49  ;;  %v3424_v39 = vadd.f32 %v1381_v34, %v4915_v15  ;;  %v1383_v40 = vpop.f32.mrb[11].mxu0  ;;  %v2085_v43 = vpack.c.bf16 %v2029_v36, %v2025_v35  ;;  %2566 = vmatpush1.bf16.msra.mxu0 %v3990_v45  ;;  %3391 = vmatpush1.bf16.msra.mxu1 %v4978_v25  ;;  %v4004_v35 = vld [vmem:[%s5334_s3 + $0x154] ss:$8 sps:$4 sm:$0xff]  }
 0x169   :  { %v3423_v41 = vadd.f32 %v3422_v33, %v4844_v50  ;;  %v3426_v51 = vadd.f32 %v1383_v40, %v4920_v16  ;;  %2567 = vmatprep.subr.bf16.mxu0 %v3995_v46  ;;  %v3996_v50 = vld [vmem:[%s5334_s3 + $0x130] ss:$8 sps:$4 sm:$0xff]   ;;  %3379 = vmatprep.subr.bf16.mxu1 %v4032_v1  ;;  %v4007_v40 = vld [vmem:[%s5334_s3 + $0x164] ss:$8 sps:$4 sm:$0xff]  }
 0x16a   :  { %v1968_v42 = vmul.f32 0.2, %v3421_v38  ;;  %v3425_v49 = vadd.f32 %v3424_v39, %v4849_v52  ;;  %2492 = vmatprep.mubr.bf16.mxu0 %v2085_v43  ;;  %vm1904_vm9 = vcmp.ge.f32.partialorder %v3421_v38, 0.0  ;;  %v4001_v52 = vld [vmem:[%s5334_s3 + $0x144] ss:$8 sps:$4 sm:$0xff]  }
 0x16b   :  { %v1969_v10 = vmul.f32 0.2, %v3423_v41  ;;  %v3427_v17 = vadd.f32 %v3426_v51, %v4851_v53  ;;  %2493 = vmatmul.mubr.bf16.gmra.mrb[36].mxu0 %v2084_v37  ;;  %vm1905_vm10 = vcmp.ge.f32.partialorder %v3423_v41, 0.0  ;;  %v4002_v37 = vld [vmem:[%s5334_s3 + $0x150] ss:$8 sps:$4 sm:$0xff]  }
 0x16c   :  { %vm1908_vm11 = vcmp.ge.f32.partialorder %v3425_v49, 0.0  ;;  %v1972_v19 = vmul.f32 0.2, %v3425_v49  ;;  %2568 = vmatpush1.bf16.msra.mxu0 %v3993_v48  ;;  %v2032_v23 = vsel %vm1904_vm9, %v3421_v38, %v1968_v42  ;;  %v4005_v42 = vld [vmem:[%s5334_s3 + $0x160] ss:$8 sps:$4 sm:$0xff]  }
 0x16d   :  { %vm1909_vm12 = vcmp.ge.f32.partialorder %v3427_v17, 0.0  ;;  %v1973_v20 = vmul.f32 0.2, %v3427_v17  ;;  %v1387_v21 = vpop.f32.mrb[12].mxu0  ;;  %2569 = vmatprep.subr.bf16.mxu0 %v3998_v54  ;;  %v2033_v27 = vsel %vm1905_vm10, %v3423_v41, %v1969_v10 }
 0x16e   :  { %v3428_v22 = vadd.f32 %v1387_v21, %v4915_v15  ;;  %v1389_v53 = vpop.f32.mrb[13].mxu0  ;;  %v2036_v24 = vsel %vm1908_vm11, %v3425_v49, %v1972_v19  ;;  %v5014_v49 = vld [vmem:[%s5336_s5 + $0x10] sm:$0xff]  }
 0x16f   :  { %v3430_v26 = vadd.f32 %v1389_v53, %v4920_v16  ;;  %v1391_v45 = vpop.f32.mrb[14].mxu0  ;;  %v2037_v28 = vsel %vm1909_vm12, %v3427_v17, %v1973_v20  ;;  %v2088_v46 = vpack.c.bf16 %v2036_v24, %v2032_v23  ;;  %v4010_v21 = vld [vmem:[%s5334_s3 + $0x174] ss:$8 sps:$4 sm:$0xff]  }
 0x170   :  { %v3429_v30 = vadd.f32 %v3428_v22, %v4858_v55  ;;  %v3432_v47 = vadd.f32 %v1391_v45, %v4915_v15  ;;  %v1393_v31 = vpop.f32.mrb[15].mxu0  ;;  %v2089_v32 = vpack.c.bf16 %v2037_v28, %v2033_v27  ;;  %2570 = vmatpush1.bf16.msra.mxu0 %v3996_v50  ;;  %v4008_v27 = vld [vmem:[%s5334_s3 + $0x170] ss:$8 sps:$4 sm:$0xff]  }
 0x171   :  { %v3431_v33 = vadd.f32 %v3430_v26, %v4860_v56  ;;  %v3434_v34 = vadd.f32 %v1393_v31, %v4920_v16  ;;  %2571 = vmatprep.subr.bf16.mxu0 %v4001_v52  ;;  %v4998_v56 = vld [vmem:[%s5336_s5 + $0x8] sm:$0xff]   ;;  %v2160_v26 = vld [vmem:[%s5334_s3 + $0x180] sm:$0x77] }
 0x172   :  { %v1976_v36 = vmul.f32 0.2, %v3429_v30  ;;  %v3433_v55 = vadd.f32 %v3432_v47, %v4862_v57  ;;  %2502 = vmatprep.mubr.bf16.mxu0 %v2089_v32  ;;  %vm1912_vm13 = vcmp.ge.f32.partialorder %v3429_v30, 0.0  ;;  %3392 = vmatpush1.bf16.msra.mxu1 %v4998_v56  ;;  %v3346_v31 = vcombine.high %v2160_v26, %v2160_v26 }
 0x173   :  { %v1977_v38 = vmul.f32 0.2, %v3431_v33  ;;  %v3435_v39 = vadd.f32 %v3434_v34, %v4864_v58  ;;  %2503 = vmatmul.mubr.bf16.gmra.mrb[40].mxu0 %v2088_v46  ;;  %vm1913_vm14 = vcmp.ge.f32.partialorder %v3431_v33, 0.0  ;;  %3380 = vmatprep.subr.bf16.mxu1 %v4032_v1  ;;  %v3345_v32 = vcombine.low %v2160_v26, %v2160_v26 }
 0x174   :  { %vm1916_vm15 = vcmp.ge.f32.partialorder %v3433_v55, 0.0  ;;  %v1980_v57 = vmul.f32 0.2, %v3433_v55  ;;  %2572 = vmatpush1.bf16.msra.mxu0 %v3999_v44  ;;  %v2040_v51 = vsel %vm1912_vm13, %v3429_v30, %v1976_v36  ;;  %v5047_v36 = vld [vmem:[%s5336_s5 + $0x20] sm:$0xff]  }
 0x175   :  { %vm1917_vm0 = vcmp.ge.f32.partialorder %v3435_v39, 0.0  ;;  %v1981_v43 = vmul.f32 0.2, %v3435_v39  ;;  %v1397_v48 = vpop.f32.mrb[16].mxu0  ;;  %2573 = vmatprep.subr.bf16.mxu0 %v4004_v35  ;;  %v2041_v19 = vsel %vm1913_vm14, %v3431_v33, %v1977_v38 }
 0x176   :  { %v3436_v41 = vadd.f32 %v1397_v48, %v4915_v15  ;;  %v1399_v58 = vpop.f32.mrb[17].mxu0  ;;  %v2044_v54 = vsel %vm1916_vm15, %v3433_v55, %v1980_v57  ;;  %3393 = vmatpush1.bf16.msra.mxu1 %v5014_v49 }
 0x177   :  { %v3438_v10 = vadd.f32 %v1399_v58, %v4920_v16  ;;  %v1401_v17 = vpop.f32.mrb[18].mxu0  ;;  %v2045_v50 = vsel %vm1917_vm0, %v3435_v39, %v1981_v43  ;;  %v2092_v20 = vpack.c.bf16 %v2044_v54, %v2040_v51  ;;  %3381 = vmatprep.subr.bf16.mxu1 %v4032_v1  ;;  %v2445_v54 = vsel %vm2443_vm2, %v3345_v32, 0 }
 0x178   :  { %v3437_v52 = vadd.f32 %v3436_v41, %v4869_v59  ;;  %v3440_v22 = vadd.f32 %v1401_v17, %v4915_v15  ;;  %v1403_v53 = vpop.f32.mrb[19].mxu0  ;;  %v2093_v23 = vpack.c.bf16 %v2045_v50, %v2041_v19  ;;  %2574 = vmatpush1.bf16.msra.mxu0 %v4002_v37 }
 0x179   :  { %v3439_v24 = vadd.f32 %v3438_v10, %v4871_v60  ;;  %v3442_v44 = vadd.f32 %v1403_v53, %v4920_v16  ;;  %2575 = vmatprep.subr.bf16.mxu0 %v4007_v40  ;;  %v5037_v60 = vld [vmem:[%s5336_s5 + $0x18] sm:$0xff]   ;;  %v5063_v10 = vld [vmem:[%s5336_s5 + $0x28] sm:$0xff]  }
 0x17a   :  { %v1984_v45 = vmul.f32 0.2, %v3437_v52  ;;  %v3441_v59 = vadd.f32 %v3440_v22, %v4873_v61  ;;  %2512 = vmatprep.mubr.bf16.mxu0 %v2093_v23  ;;  %vm1920_vm1 = vcmp.ge.f32.partialorder %v3437_v52, 0.0  ;;  %3394 = vmatpush1.bf16.msra.mxu1 %v5037_v60  ;;  %v5074_v22 = vld [vmem:[%s5336_s5 + $0x30] sm:$0xff]  }
 0x17b   :  { %v1985_v28 = vmul.f32 0.2, %v3439_v24  ;;  %v3443_v46 = vadd.f32 %v3442_v44, %v4875_v62  ;;  %2513 = vmatmul.mubr.bf16.gmra.mrb[44].mxu0 %v2092_v20  ;;  %vm1921_vm3 = vcmp.ge.f32.partialorder %v3439_v24, 0.0  ;;  %3382 = vmatprep.subr.bf16.mxu1 %v4032_v1 }
 0x17c   :  { %vm1924_vm4 = vcmp.ge.f32.partialorder %v3441_v59, 0.0  ;;  %v1988_v30 = vmul.f32 0.2, %v3441_v59  ;;  %2576 = vmatpush1.bf16.msra.mxu0 %v4005_v42  ;;  %v2048_v62 = vsel %vm1920_vm1, %v3437_v52, %v1984_v45 }
 0x17d   :  { %vm1925_vm5 = vcmp.ge.f32.partialorder %v3443_v46, 0.0  ;;  %v1989_v61 = vmul.f32 0.2, %v3443_v46  ;;  %v1407_v47 = vpop.f32.mrb[20].mxu0  ;;  %2577 = vmatprep.subr.bf16.mxu0 %v4010_v21  ;;  %v2049_v38 = vsel %vm1921_vm3, %v3439_v24, %v1985_v28 }
 0x17e   :  { %v3444_v33 = vadd.f32 %v1407_v47, %v4915_v15  ;;  %v1409_v34 = vpop.f32.mrb[21].mxu0  ;;  %v2052_v35 = vsel %vm1924_vm4, %v3441_v59, %v1988_v30  ;;  %3395 = vmatpush1.bf16.msra.mxu1 %v5047_v36 }
 0x17f   :  { %v3446_v55 = vadd.f32 %v1409_v34, %v4920_v16  ;;  %v1411_v37 = vpop.f32.mrb[22].mxu0  ;;  %v2053_v39 = vsel %vm1925_vm5, %v3443_v46, %v1989_v61  ;;  %v2096_v40 = vpack.c.bf16 %v2052_v35, %v2048_v62  ;;  %3383 = vmatprep.subr.bf16.mxu1 %v4032_v1 }
 0x180   :  { %v3445_v57 = vadd.f32 %v3444_v33, %v4879_v63  ;;  %v3448_v43 = vadd.f32 %v1411_v37, %v4915_v15  ;;  %v1413_v48 = vpop.f32.mrb[23].mxu0  ;;  %v2097_v41 = vpack.c.bf16 %v2053_v39, %v2049_v38  ;;  %2578 = vmatpush1.bf16.msra.mxu0 %v4008_v27 }
 0x181   :  { %v3447_v58 = vadd.f32 %v3446_v55, %v4881_v0  ;;  %v3450_v51 = vadd.f32 %v1413_v48, %v4920_v16  ;;  %3347 = vmatprep.subr.msk.bf16.mxu0 %vm2443_vm2, %v3346_v31 }
 0x182   :  { %v1992_v42 = vmul.f32 0.2, %v3445_v57  ;;  %v3449_v63 = vadd.f32 %v3448_v43, %v4883_v2  ;;  %2522 = vmatprep.mubr.bf16.mxu0 %v2097_v41  ;;  %vm1928_vm6 = vcmp.ge.f32.partialorder %v3445_v57, 0.0  ;;  %3396 = vmatpush1.bf16.msra.mxu1 %v5063_v10 }
 0x183   :  { %v1993_v17 = vmul.f32 0.2, %v3447_v58  ;;  %v3451_v0 = vadd.f32 %v3450_v51, %v4885_v18  ;;  %2523 = vmatmul.mubr.bf16.gmra.mrb[48].mxu0 %v2096_v40  ;;  %vm1929_vm7 = vcmp.ge.f32.partialorder %v3447_v58, 0.0  ;;  %3384 = vmatprep.subr.bf16.mxu1 %v4032_v1 }
 0x184   :  { %vm1932_vm8 = vcmp.ge.f32.partialorder %v3449_v63, 0.0  ;;  %v1996_v19 = vmul.f32 0.2, %v3449_v63  ;;  %2580 = vmatpush1.bf16.msra.mxu0 %v2445_v54  ;;  %v2056_v52 = vsel %vm1928_vm6, %v3445_v57, %v1992_v42  ;;  %vm2418_vm6 = vcmask 48128  }
 0x185   :  { %vm1933_vm9 = vcmp.ge.f32.partialorder %v3451_v0, 0.0  ;;  %v1997_v50 = vmul.f32 0.2, %v3451_v0  ;;  %v1417_v2 = vpop.f32.mrb[24].mxu0  ;;  %2927 = vmatprep.subr.bf16.mxu0 %v4032_v1  ;;  %v2057_v24 = vsel %vm1929_vm7, %v3447_v58, %v1993_v17 }
 0x186   :  { %v3452_v20 = vadd.f32 %v1417_v2, %v4915_v15  ;;  %v1419_v21 = vpop.f32.mrb[25].mxu0  ;;  %v2060_v18 = vsel %vm1932_vm8, %v3449_v63, %v1996_v19  ;;  %3397 = vmatpush1.bf16.msra.mxu1 %v5074_v22 }
 0x187   :  { %v3454_v53 = vadd.f32 %v1419_v21, %v4920_v16  ;;  %v1421_v23 = vpop.f32.mrb[26].mxu0  ;;  %v2061_v44 = vsel %vm1933_vm9, %v3451_v0, %v1997_v50  ;;  %v2100_v26 = vpack.c.bf16 %v2060_v18, %v2056_v52  ;;  %3385 = vmatprep.subr.bf16.mxu1 %v4032_v1  ;;  %v239_v21 = vsub.s32 3, %v4903_v11 }
 0x188   :  { %v3453_v45 = vadd.f32 %v3452_v20, %v4887_v3  ;;  %v3456_v59 = vadd.f32 %v1421_v23, %v4915_v15  ;;  %v1423_v27 = vpop.f32.mrb[27].mxu0  ;;  %v2101_v28 = vpack.c.bf16 %v2061_v44, %v2057_v24  ;;  %v5088_v3 = vld [vmem:[%s5336_s5 + $0x38] sm:$0xff]  }
 0x189   :  { %v3455_v46 = vadd.f32 %v3454_v53, %v4889_v4  ;;  %v3458_v30 = vadd.f32 %v1423_v27, %v4920_v16  ;;  %v5121_v18 = vrot.slane %v4909_v13, %v239_v21 }
 0x18a   :  { %v2000_v61 = vmul.f32 0.2, %v3453_v45  ;;  %v3457_v47 = vadd.f32 %v3456_v59, %v4891_v5  ;;  %2532 = vmatprep.mubr.bf16.mxu0 %v2101_v28  ;;  %vm1936_vm10 = vcmp.ge.f32.partialorder %v3453_v45, 0.0  ;;  %3398 = vmatpush1.bf16.msra.mxu1 %v5088_v3 }
 0x18b   :  { %v2001_v31 = vmul.f32 0.2, %v3455_v46  ;;  %v3459_v32 = vadd.f32 %v3458_v30, %v4893_v6  ;;  %2533 = vmatmul.mubr.bf16.gmra.mrb[52].mxu0 %v2100_v26  ;;  %vm1937_vm11 = vcmp.ge.f32.partialorder %v3455_v46, 0.0  ;;  %3386 = vmatprep.subr.bf16.mxu1 %v4032_v1  ;;  %v5097_v6 = vld [vmem:[%s5336_s5 + $0x40] sm:$0xff]  }
 0x18c   :  { %vm1940_vm12 = vcmp.ge.f32.partialorder %v3457_v47, 0.0  ;;  %v2004_v4 = vmul.f32 0.2, %v3457_v47  ;;  %v2064_v35 = vsel %vm1936_vm10, %v3453_v45, %v2000_v61 }
 0x18d   :  { %vm1941_vm13 = vcmp.ge.f32.partialorder %v3459_v32, 0.0  ;;  %v2005_v33 = vmul.f32 0.2, %v3459_v32  ;;  %v1427_v34 = vpop.f32.mrb[28].mxu0  ;;  %v2065_v39 = vsel %vm1937_vm11, %v3455_v46, %v2001_v31 }
 0x18e   :  { %v3460_v5 = vadd.f32 %v1427_v34, %v4915_v15  ;;  %v1429_v62 = vpop.f32.mrb[29].mxu0  ;;  %v2068_v55 = vsel %vm1940_vm12, %v3457_v47, %v2004_v4  ;;  %3399 = vmatpush1.bf16.msra.mxu1 %v5097_v6 }
 0x18f   :  { %v3462_v37 = vadd.f32 %v1429_v62, %v4920_v16  ;;  %v1431_v38 = vpop.f32.mrb[30].mxu0  ;;  %v2069_v40 = vsel %vm1941_vm13, %v3459_v32, %v2005_v33  ;;  %v2104_v57 = vpack.c.bf16 %v2068_v55, %v2064_v35  ;;  %3387 = vmatprep.subr.bf16.mxu1 %v4032_v1 }
 0x190   :  { %v3461_v43 = vadd.f32 %v3460_v5, %v4895_v7  ;;  %v3464_v48 = vadd.f32 %v1431_v38, %v4915_v15  ;;  %v1433_v41 = vpop.f32.mrb[31].mxu0  ;;  %v2105_v58 = vpack.c.bf16 %v2069_v40, %v2065_v39  ;;  %v5110_v7 = vld [vmem:[%s5336_s5 + $0x48] sm:$0xff]  }
 0x191   :  { %v3463_v51 = vadd.f32 %v3462_v37, %v4897_v8  ;;  %v3466_v54 = vadd.f32 %v1433_v41, %v4920_v16 }
 0x192   :  { %v2008_v42 = vmul.f32 0.2, %v3461_v43  ;;  %v3465_v63 = vadd.f32 %v3464_v48, %v4899_v29  ;;  %2542 = vmatprep.mubr.bf16.mxu0 %v2105_v58  ;;  %vm1944_vm14 = vcmp.ge.f32.partialorder %v3461_v43, 0.0  ;;  %3400 = vmatpush1.bf16.msra.mxu1 %v5110_v7 }
 0x193   :  { %v2009_v15 = vmul.f32 0.2, %v3463_v51  ;;  %v3467_v17 = vadd.f32 %v3466_v54, %v4901_v9  ;;  %2543 = vmatmul.mubr.bf16.gmra.mrb[56].mxu0 %v2104_v57  ;;  %vm1945_vm15 = vcmp.ge.f32.partialorder %v3463_v51, 0.0  ;;  %3388 = vmatprep.subr.bf16.mxu1 %v4032_v1  ;;  %v235_v9 = vsub.s32 2, %v4903_v11 }
 0x194   :  { %vm1948_vm0 = vcmp.ge.f32.partialorder %v3465_v63, 0.0  ;;  %v2012_v8 = vmul.f32 0.2, %v3465_v63  ;;  %v2072_v29 = vsel %vm1944_vm14, %v3461_v43, %v2008_v42 }
 0x195   :  { %vm1949_vm1 = vcmp.ge.f32.partialorder %v3467_v17, 0.0  ;;  %v2013_v16 = vmul.f32 0.2, %v3467_v17  ;;  %v2073_v19 = vsel %vm1945_vm15, %v3463_v51, %v2009_v15  ;;  %v5118_v52 = vrot.slane %v4909_v13, %v235_v9 }
 0x196   :  { %v2076_v0 = vsel %vm1948_vm0, %v3465_v63, %v2012_v8 }
 0x197   :  { %v2077_v50 = vsel %vm1949_vm1, %v3467_v17, %v2013_v16  ;;  %v2108_v2 = vpack.c.bf16 %v2076_v0, %v2072_v29 }
 0x198   :  { %v2109_v20 = vpack.c.bf16 %v2077_v50, %v2073_v19 }
 0x19a   :  { %2552 = vmatprep.mubr.bf16.mxu0 %v2109_v20 }
 0x19b   :  { %2553 = vmatmul.mubr.bf16.gmra.mrb[60].mxu0 %v2108_v2 }
 0x1aa   :  { %v1809_v53 = vpop.f32.mrb[32].mxu1 }
 0x1ab   :  { %v3468_v23 = vadd.f32 %v1809_v53, %v5118_v52  ;;  %v1811_v24 = vpop.f32.mrb[33].mxu1 }
 0x1ac   :  { %v3469_v44 = vadd.f32 %v1811_v24, %v5121_v18  ;;  %v1813_v26 = vpop.f32.mrb[34].mxu1 }
 0x1ad   :  { %v1954_v45 = vmul.f32 0.2, %v3468_v23  ;;  %v3470_v59 = vadd.f32 %v1813_v26, %v5118_v52  ;;  %v1815_v27 = vpop.f32.mrb[35].mxu1  ;;  %vm1890_vm2 = vcmp.ge.f32.partialorder %v3468_v23, 0.0 }
 0x1ae   :  { %v1955_v28 = vmul.f32 0.2, %v3469_v44  ;;  %v3471_v46 = vadd.f32 %v1815_v27, %v5121_v18  ;;  %vm1891_vm3 = vcmp.ge.f32.partialorder %v3469_v44, 0.0 }
 0x1af   :  { %vm1894_vm4 = vcmp.ge.f32.partialorder %v3470_v59, 0.0  ;;  %v1958_v30 = vmul.f32 0.2, %v3470_v59  ;;  %v2018_v61 = vsel %vm1890_vm2, %v3468_v23, %v1954_v45 }
 0x1b0   :  { %vm1895_vm5 = vcmp.ge.f32.partialorder %v3471_v46, 0.0  ;;  %v1959_v13 = vmul.f32 0.2, %v3471_v46  ;;  %v2019_v31 = vsel %vm1891_vm3, %v3469_v44, %v1955_v28 }
 0x1b1   :  { %v2022_v47 = vsel %vm1894_vm4, %v3470_v59, %v1958_v30 }
 0x1b2   :  { %v2082_v32 = vpack.c.bf16 %v2022_v47, %v2018_v61  ;;  %v2023_v4 = vsel %vm1895_vm5, %v3471_v46, %v1959_v13  ;;  %v1819_v33 = vpop.f32.mrb[36].mxu1 }
 0x1b3   :  { %v2083_v34 = vpack.c.bf16 %v2023_v4, %v2019_v31  ;;  %v3472_v5 = vadd.f32 %v1819_v33, %v5118_v52  ;;  %v1821_v62 = vpop.f32.mrb[37].mxu1 }
 0x1b4   :  { %v3473_v35 = vadd.f32 %v1821_v62, %v5121_v18  ;;  %v1823_v55 = vpop.f32.mrb[38].mxu1 }
 0x1b5   :  { %v1962_v37 = vmul.f32 0.2, %v3472_v5  ;;  %v3474_v38 = vadd.f32 %v1823_v55, %v5118_v52  ;;  %v1825_v39 = vpop.f32.mrb[39].mxu1  ;;  %3348 = vmatprep.mubr.msk.bf16.mxu0 %vm2418_vm6, %v2083_v34  ;;  %vm1898_vm7 = vcmp.ge.f32.partialorder %v3472_v5, 0.0 }
 0x1b6   :  { %v1963_v40 = vmul.f32 0.2, %v3473_v35  ;;  %v3475_v57 = vadd.f32 %v1825_v39, %v5121_v18  ;;  %2596 = vmatmul.mubr.bf16.vlgmr.msra.gmra.mrb[32].mxu0 %v2082_v32  ;;  %vm1899_vm8 = vcmp.ge.f32.partialorder %v3473_v35, 0.0 }
 0x1b7   :  { %vm1902_vm9 = vcmp.ge.f32.partialorder %v3474_v38, 0.0  ;;  %v1966_v43 = vmul.f32 0.2, %v3474_v38  ;;  %2928 = vmatpush1.bf16.msra.mxu0 %v4978_v25  ;;  %v2026_v41 = vsel %vm1898_vm7, %v3472_v5, %v1962_v37 }
 0x1b8   :  { %vm1903_vm10 = vcmp.ge.f32.partialorder %v3475_v57, 0.0  ;;  %v1967_v48 = vmul.f32 0.2, %v3475_v57  ;;  %2929 = vmatprep.subr.bf16.mxu0 %v4032_v1  ;;  %v2027_v51 = vsel %vm1899_vm8, %v3473_v35, %v1963_v40 }
 0x1b9   :  { %v2030_v58 = vsel %vm1902_vm9, %v3474_v38, %v1966_v43 }
 0x1ba   :  { %v2031_v54 = vsel %vm1903_vm10, %v3475_v57, %v1967_v48  ;;  %v1829_v42 = vpop.f32.mrb[40].mxu1  ;;  %v2086_v63 = vpack.c.bf16 %v2030_v58, %v2026_v41 }
 0x1bb   :  { %v2087_v15 = vpack.c.bf16 %v2031_v54, %v2027_v51  ;;  %v3476_v17 = vadd.f32 %v1829_v42, %v5118_v52  ;;  %v1831_v8 = vpop.f32.mrb[41].mxu1  ;;  %2930 = vmatpush1.bf16.msra.mxu0 %v4998_v56 }
 0x1bc   :  { %v3477_v16 = vadd.f32 %v1831_v8, %v5121_v18  ;;  %v1833_v29 = vpop.f32.mrb[42].mxu1  ;;  %2931 = vmatprep.subr.bf16.mxu0 %v4032_v1 }
 0x1bd   :  { %v1970_v25 = vmul.f32 0.2, %v3476_v17  ;;  %v3478_v0 = vadd.f32 %v1833_v29, %v5118_v52  ;;  %v1835_v19 = vpop.f32.mrb[43].mxu1  ;;  %3349 = vmatprep.mubr.msk.bf16.mxu0 %vm2418_vm6, %v2087_v15  ;;  %vm1906_vm11 = vcmp.ge.f32.partialorder %v3476_v17, 0.0 }
 0x1be   :  { %v1971_v50 = vmul.f32 0.2, %v3477_v16  ;;  %v3479_v2 = vadd.f32 %v1835_v19, %v5121_v18  ;;  %2606 = vmatmul.mubr.bf16.gmra.mrb[36].mxu0 %v2086_v63  ;;  %vm1907_vm12 = vcmp.ge.f32.partialorder %v3477_v16, 0.0 }
 0x1bf   :  { %vm1910_vm13 = vcmp.ge.f32.partialorder %v3478_v0, 0.0  ;;  %v1974_v20 = vmul.f32 0.2, %v3478_v0  ;;  %2932 = vmatpush1.bf16.msra.mxu0 %v5014_v49  ;;  %v2034_v9 = vsel %vm1906_vm11, %v3476_v17, %v1970_v25 }
 0x1c0   :  { %vm1911_vm14 = vcmp.ge.f32.partialorder %v3479_v2, 0.0  ;;  %v1975_v56 = vmul.f32 0.2, %v3479_v2  ;;  %2933 = vmatprep.subr.bf16.mxu0 %v4032_v1  ;;  %v2035_v53 = vsel %vm1907_vm12, %v3477_v16, %v1971_v50 }
 0x1c1   :  { %v2038_v21 = vsel %vm1910_vm13, %v3478_v0, %v1974_v20 }
 0x1c2   :  { %v2039_v23 = vsel %vm1911_vm14, %v3479_v2, %v1975_v56  ;;  %v1839_v24 = vpop.f32.mrb[44].mxu1  ;;  %v2090_v44 = vpack.c.bf16 %v2038_v21, %v2034_v9 }
 0x1c3   :  { %v2091_v26 = vpack.c.bf16 %v2039_v23, %v2035_v53  ;;  %v3480_v45 = vadd.f32 %v1839_v24, %v5118_v52  ;;  %v1841_v59 = vpop.f32.mrb[45].mxu1  ;;  %2934 = vmatpush1.bf16.msra.mxu0 %v5037_v60 }
 0x1c4   :  { %v3481_v27 = vadd.f32 %v1841_v59, %v5121_v18  ;;  %v1843_v28 = vpop.f32.mrb[46].mxu1  ;;  %2935 = vmatprep.subr.bf16.mxu0 %v4032_v1 }
 0x1c5   :  { %v1978_v49 = vmul.f32 0.2, %v3480_v45  ;;  %v3482_v46 = vadd.f32 %v1843_v28, %v5118_v52  ;;  %v1845_v30 = vpop.f32.mrb[47].mxu1  ;;  %3350 = vmatprep.mubr.msk.bf16.mxu0 %vm2418_vm6, %v2091_v26  ;;  %vm1914_vm15 = vcmp.ge.f32.partialorder %v3480_v45, 0.0 }
 0x1c6   :  { %v1979_v13 = vmul.f32 0.2, %v3481_v27  ;;  %v3483_v61 = vadd.f32 %v1845_v30, %v5121_v18  ;;  %2616 = vmatmul.mubr.bf16.gmra.mrb[40].mxu0 %v2090_v44  ;;  %vm1915_vm0 = vcmp.ge.f32.partialorder %v3481_v27, 0.0 }
 0x1c7   :  { %vm1918_vm1 = vcmp.ge.f32.partialorder %v3482_v46, 0.0  ;;  %v1982_v47 = vmul.f32 0.2, %v3482_v46  ;;  %2936 = vmatpush1.bf16.msra.mxu0 %v5047_v36  ;;  %v2042_v31 = vsel %vm1914_vm15, %v3480_v45, %v1978_v49 }
 0x1c8   :  { %vm1919_vm2 = vcmp.ge.f32.partialorder %v3483_v61, 0.0  ;;  %v1983_v60 = vmul.f32 0.2, %v3483_v61  ;;  %2937 = vmatprep.subr.bf16.mxu0 %v4032_v1  ;;  %v2043_v4 = vsel %vm1915_vm0, %v3481_v27, %v1979_v13 }
 0x1c9   :  { %v2046_v32 = vsel %vm1918_vm1, %v3482_v46, %v1982_v47 }
 0x1ca   :  { %v2047_v33 = vsel %vm1919_vm2, %v3483_v61, %v1983_v60  ;;  %v1849_v34 = vpop.f32.mrb[48].mxu1  ;;  %v2094_v5 = vpack.c.bf16 %v2046_v32, %v2042_v31 }
 0x1cb   :  { %v2095_v62 = vpack.c.bf16 %v2047_v33, %v2043_v4  ;;  %v3484_v35 = vadd.f32 %v1849_v34, %v5118_v52  ;;  %v1851_v55 = vpop.f32.mrb[49].mxu1  ;;  %2938 = vmatpush1.bf16.msra.mxu0 %v5063_v10 }
 0x1cc   :  { %v3485_v37 = vadd.f32 %v1851_v55, %v5121_v18  ;;  %v1853_v38 = vpop.f32.mrb[50].mxu1  ;;  %2939 = vmatprep.subr.bf16.mxu0 %v4032_v1 }
 0x1cd   :  { %v1986_v36 = vmul.f32 0.2, %v3484_v35  ;;  %v3486_v39 = vadd.f32 %v1853_v38, %v5118_v52  ;;  %v1855_v40 = vpop.f32.mrb[51].mxu1  ;;  %3351 = vmatprep.mubr.msk.bf16.mxu0 %vm2418_vm6, %v2095_v62  ;;  %vm1922_vm3 = vcmp.ge.f32.partialorder %v3484_v35, 0.0 }
 0x1ce   :  { %v1987_v57 = vmul.f32 0.2, %v3485_v37  ;;  %v3487_v43 = vadd.f32 %v1855_v40, %v5121_v18  ;;  %2626 = vmatmul.mubr.bf16.gmra.mrb[44].mxu0 %v2094_v5  ;;  %vm1923_vm4 = vcmp.ge.f32.partialorder %v3485_v37, 0.0 }
 0x1cf   :  { %vm1926_vm5 = vcmp.ge.f32.partialorder %v3486_v39, 0.0  ;;  %v1990_v48 = vmul.f32 0.2, %v3486_v39  ;;  %2940 = vmatpush1.bf16.msra.mxu0 %v5074_v22  ;;  %v2050_v41 = vsel %vm1922_vm3, %v3484_v35, %v1986_v36 }
 0x1d0   :  { %vm1927_vm7 = vcmp.ge.f32.partialorder %v3487_v43, 0.0  ;;  %v1991_v10 = vmul.f32 0.2, %v3487_v43  ;;  %2941 = vmatprep.subr.bf16.mxu0 %v4032_v1  ;;  %v2051_v51 = vsel %vm1923_vm4, %v3485_v37, %v1987_v57 }
 0x1d1   :  { %v2054_v58 = vsel %vm1926_vm5, %v3486_v39, %v1990_v48 }
 0x1d2   :  { %v2055_v54 = vsel %vm1927_vm7, %v3487_v43, %v1991_v10  ;;  %v1859_v42 = vpop.f32.mrb[52].mxu1  ;;  %v2098_v63 = vpack.c.bf16 %v2054_v58, %v2050_v41 }
 0x1d3   :  { %v2099_v15 = vpack.c.bf16 %v2055_v54, %v2051_v51  ;;  %v3488_v17 = vadd.f32 %v1859_v42, %v5118_v52  ;;  %v1861_v8 = vpop.f32.mrb[53].mxu1  ;;  %2942 = vmatpush1.bf16.msra.mxu0 %v5088_v3  ;;  %v4025_v51 = vld [vmem:[%s5336_s5 + $0x60] sm:$0x3f]  }
 0x1d4   :  { %v3489_v16 = vadd.f32 %v1861_v8, %v5121_v18  ;;  %v1863_v29 = vpop.f32.mrb[54].mxu1  ;;  %2943 = vmatprep.subr.bf16.mxu0 %v4032_v1  ;;  %v2161_v42 = vld [vmem:[%s5337_s4] sm:$0x3] }
 0x1d5   :  { %v1994_v22 = vmul.f32 0.2, %v3488_v17  ;;  %v3490_v25 = vadd.f32 %v1863_v29, %v5118_v52  ;;  %v1865_v0 = vpop.f32.mrb[55].mxu1  ;;  %3352 = vmatprep.mubr.msk.bf16.mxu0 %vm2418_vm6, %v2099_v15  ;;  %vm1930_vm8 = vcmp.ge.f32.partialorder %v3488_v17, 0.0  ;;  %v5205_v15 = vrot.slane %v2161_v42, %v231_v14 }
 0x1d6   :  { %v1995_v19 = vmul.f32 0.2, %v3489_v16  ;;  %v3491_v50 = vadd.f32 %v1865_v0, %v5121_v18  ;;  %2636 = vmatmul.mubr.bf16.gmra.mrb[48].mxu0 %v2098_v63  ;;  %vm1931_vm9 = vcmp.ge.f32.partialorder %v3489_v16, 0.0  ;;  %v5201_v63 = vrot.slane %v2161_v42, %v227_v12 }
 0x1d7   :  { %vm1934_vm10 = vcmp.ge.f32.partialorder %v3490_v25, 0.0  ;;  %v1998_v2 = vmul.f32 0.2, %v3490_v25  ;;  %2944 = vmatpush1.bf16.msra.mxu0 %v5097_v6  ;;  %v2058_v20 = vsel %vm1930_vm8, %v3488_v17, %v1994_v22 }
 0x1d8   :  { %vm1935_vm11 = vcmp.ge.f32.partialorder %v3491_v50, 0.0  ;;  %v1999_v3 = vmul.f32 0.2, %v3491_v50  ;;  %2945 = vmatprep.subr.bf16.mxu0 %v4032_v1  ;;  %v2059_v9 = vsel %vm1931_vm9, %v3489_v16, %v1995_v19  ;;  %vm2898_vm9 = vcmask 621568  }
 0x1d9   :  { %v2062_v56 = vsel %vm1934_vm10, %v3490_v25, %v1998_v2 }
 0x1da   :  { %v2063_v21 = vsel %vm1935_vm11, %v3491_v50, %v1999_v3  ;;  %v1869_v53 = vpop.f32.mrb[56].mxu1  ;;  %v2102_v23 = vpack.c.bf16 %v2062_v56, %v2058_v20 }
 0x1db   :  { %v2103_v24 = vpack.c.bf16 %v2063_v21, %v2059_v9  ;;  %v3492_v44 = vadd.f32 %v1869_v53, %v5118_v52  ;;  %v1871_v26 = vpop.f32.mrb[57].mxu1  ;;  %2946 = vmatpush1.bf16.msra.mxu0 %v5110_v7 }
 0x1dc   :  { %v3493_v45 = vadd.f32 %v1871_v26, %v5121_v18  ;;  %v1873_v59 = vpop.f32.mrb[58].mxu1  ;;  %2947 = vmatprep.subr.bf16.mxu0 %v4032_v1 }
 0x1dd   :  { %v2002_v6 = vmul.f32 0.2, %v3492_v44  ;;  %v3494_v27 = vadd.f32 %v1873_v59, %v5118_v52  ;;  %v1875_v28 = vpop.f32.mrb[59].mxu1  ;;  %3353 = vmatprep.mubr.msk.bf16.mxu0 %vm2418_vm6, %v2103_v24  ;;  %vm1938_vm12 = vcmp.ge.f32.partialorder %v3492_v44, 0.0 }
 0x1de   :  { %v2003_v49 = vmul.f32 0.2, %v3493_v45  ;;  %v3495_v46 = vadd.f32 %v1875_v28, %v5121_v18  ;;  %2646 = vmatmul.mubr.bf16.gmra.mrb[52].mxu0 %v2102_v23  ;;  %vm1939_vm13 = vcmp.ge.f32.partialorder %v3493_v45, 0.0 }
 0x1df   :  { %vm1942_vm14 = vcmp.ge.f32.partialorder %v3494_v27, 0.0  ;;  %v2006_v30 = vmul.f32 0.2, %v3494_v27  ;;  %v2066_v13 = vsel %vm1938_vm12, %v3492_v44, %v2002_v6 }
 0x1e0   :  { %vm1943_vm15 = vcmp.ge.f32.partialorder %v3495_v46, 0.0  ;;  %v2007_v7 = vmul.f32 0.2, %v3495_v46  ;;  %v2067_v47 = vsel %vm1939_vm13, %v3493_v45, %v2003_v49 }
 0x1e1   :  { %v2070_v61 = vsel %vm1942_vm14, %v3494_v27, %v2006_v30 }
 0x1e2   :  { %v2071_v60 = vsel %vm1943_vm15, %v3495_v46, %v2007_v7  ;;  %v1879_v31 = vpop.f32.mrb[60].mxu1  ;;  %v2106_v32 = vpack.c.bf16 %v2070_v61, %v2066_v13 }
 0x1e3   :  { %v2107_v4 = vpack.c.bf16 %v2071_v60, %v2067_v47  ;;  %v3496_v33 = vadd.f32 %v1879_v31, %v5118_v52  ;;  %v1881_v34 = vpop.f32.mrb[61].mxu1 }
 0x1e4   :  { %v3497_v5 = vadd.f32 %v1881_v34, %v5121_v18  ;;  %v1883_v62 = vpop.f32.mrb[62].mxu1 }
 0x1e5   :  { %v2010_v35 = vmul.f32 0.2, %v3496_v33  ;;  %v3498_v55 = vadd.f32 %v1883_v62, %v5118_v52  ;;  %v1885_v37 = vpop.f32.mrb[63].mxu1  ;;  %3354 = vmatprep.mubr.msk.bf16.mxu0 %vm2418_vm6, %v2107_v4  ;;  %vm1946_vm0 = vcmp.ge.f32.partialorder %v3496_v33, 0.0  ;;  %v4023_v52 = vld [vmem:[%s5336_s5 + $0x50] sm:$0xff]  }
 0x1e6   :  { %v2011_v38 = vmul.f32 0.2, %v3497_v5  ;;  %v3499_v36 = vadd.f32 %v1885_v37, %v5121_v18  ;;  %2656 = vmatmul.mubr.bf16.gmra.mrb[56].mxu0 %v2106_v32  ;;  %vm1947_vm1 = vcmp.ge.f32.partialorder %v3497_v5, 0.0  ;;  %3401 = vmatpush1.bf16.msra.mxu1 %v4023_v52  ;;  %v4024_v18 = vld [vmem:[%s5336_s5 + $0x58] sm:$0xff]  }
 0x1e7   :  { %vm1950_vm2 = vcmp.ge.f32.partialorder %v3498_v55, 0.0  ;;  %v2014_v39 = vmul.f32 0.2, %v3498_v55  ;;  %v2074_v57 = vsel %vm1946_vm0, %v3496_v33, %v2010_v35  ;;  %2948 = vmatpush1.bf16.msra.mxu0 %v4023_v52  ;;  %3389 = vmatprep.subr.bf16.mxu1 %v4032_v1 }
 0x1e8   :  { %vm1951_vm3 = vcmp.ge.f32.partialorder %v3499_v36, 0.0  ;;  %v2015_v40 = vmul.f32 0.2, %v3499_v36  ;;  %v2075_v48 = vsel %vm1947_vm1, %v3497_v5, %v2011_v38  ;;  %2949 = vmatprep.subr.bf16.mxu0 %v4032_v1 }
 0x1e9   :  { %v2078_v43 = vsel %vm1950_vm2, %v3498_v55, %v2014_v39 }
 0x1ea   :  { %v2079_v10 = vsel %vm1951_vm3, %v3499_v36, %v2015_v40  ;;  %v2110_v41 = vpack.c.bf16 %v2078_v43, %v2074_v57  ;;  %3402 = vmatpush1.bf16.msra.mxu1 %v4024_v18 }
 0x1eb   :  { %v2111_v58 = vpack.c.bf16 %v2079_v10, %v2075_v48  ;;  %2950 = vmatpush1.bf16.msra.mxu0 %v4024_v18  ;;  %3390 = vmatprep.subr.bf16.mxu1 %v4032_v1 }
 0x1ec   :  { %2951 = vmatprep.subr.bf16.mxu0 %v4032_v1 }
 0x1ed   :  { %3355 = vmatprep.mubr.msk.bf16.mxu0 %vm2418_vm6, %v2111_v58  ;;  %vm2923_vm6 = vcmask 1045504  }
 0x1ee   :  { %2666 = vmatmul.mubr.bf16.gmra.mrb[60].mxu0 %v2110_v41  ;;  %v2925_v54 = vsel %vm2923_vm6, %v4025_v51, 0 }
 0x1ef   :  { %2952 = vmatpush1.bf16.msra.mxu0 %v2925_v54  ;;  %3403 = vmatpush1.bf16.msra.mxu1 %v2925_v54 }
 0x289   :  { %v2597_v17 = vpop.f32.mrb[32].mxu0 }
 0x28a   :  { %v3500_v8 = vadd.f32 %v2597_v17, %v5201_v63  ;;  %v2599_v1 = vpop.f32.mrb[33].mxu0 }
 0x28b   :  { %v3501_v16 = vadd.f32 %v2599_v1, %v5205_v15  ;;  %v2601_v29 = vpop.f32.mrb[34].mxu0 }
 0x28c   :  { %v2708_v22 = vmul.f32 0.2, %v3500_v8  ;;  %v3502_v25 = vadd.f32 %v2601_v29, %v5201_v63  ;;  %v2603_v0 = vpop.f32.mrb[35].mxu0  ;;  %vm2676_vm4 = vcmp.ge.f32.partialorder %v3500_v8, 0.0 }
 0x28d   :  { %v2709_v19 = vmul.f32 0.2, %v3501_v16  ;;  %v3503_v12 = vadd.f32 %v2603_v0, %v5205_v15  ;;  %vm2677_vm5 = vcmp.ge.f32.partialorder %v3501_v16, 0.0 }
 0x28e   :  { %vm2678_vm7 = vcmp.ge.f32.partialorder %v3502_v25, 0.0  ;;  %v2710_v11 = vmul.f32 0.2, %v3502_v25  ;;  %v2740_v50 = vsel %vm2676_vm4, %v3500_v8, %v2708_v22 }
 0x28f   :  { %vm2679_vm8 = vcmp.ge.f32.partialorder %v3503_v12, 0.0  ;;  %v2711_v14 = vmul.f32 0.2, %v3503_v12  ;;  %v2741_v3 = vsel %vm2677_vm5, %v3501_v16, %v2709_v19 }
 0x290   :  { %v2742_v2 = vsel %vm2678_vm7, %v3502_v25, %v2710_v11 }
 0x291   :  { %v2772_v20 = vpack.c.bf16 %v2742_v2, %v2740_v50  ;;  %v2743_v56 = vsel %vm2679_vm8, %v3503_v12, %v2711_v14  ;;  %v2607_v9 = vpop.f32.mrb[36].mxu0 }
 0x292   :  { %v2773_v21 = vpack.c.bf16 %v2743_v56, %v2741_v3  ;;  %v3504_v53 = vadd.f32 %v2607_v9, %v5201_v63  ;;  %v2609_v23 = vpop.f32.mrb[37].mxu0 }
 0x293   :  { %v3505_v24 = vadd.f32 %v2609_v23, %v5205_v15  ;;  %v2611_v44 = vpop.f32.mrb[38].mxu0 }
 0x294   :  { %v2712_v26 = vmul.f32 0.2, %v3504_v53  ;;  %v3506_v45 = vadd.f32 %v2611_v44, %v5201_v63  ;;  %v2613_v59 = vpop.f32.mrb[39].mxu0  ;;  %3370 = vmatprep.mubr.msk.bf16.mxu0 %vm2898_vm9, %v2773_v21  ;;  %vm2680_vm10 = vcmp.ge.f32.partialorder %v3504_v53, 0.0 }
 0x295   :  { %v2713_v6 = vmul.f32 0.2, %v3505_v24  ;;  %v3507_v27 = vadd.f32 %v2613_v59, %v5205_v15  ;;  %2960 = vmatmul.mubr.bf16.vlgmr.msra.gmra.mrb[64].mxu0 %v2772_v20  ;;  %vm2681_vm11 = vcmp.ge.f32.partialorder %v3505_v24, 0.0 }
 0x296   :  { %vm2682_vm12 = vcmp.ge.f32.partialorder %v3506_v45, 0.0  ;;  %v2714_v28 = vmul.f32 0.2, %v3506_v45  ;;  %v2744_v46 = vsel %vm2680_vm10, %v3504_v53, %v2712_v26 }
 0x297   :  { %vm2683_vm13 = vcmp.ge.f32.partialorder %v3507_v27, 0.0  ;;  %v2715_v49 = vmul.f32 0.2, %v3507_v27  ;;  %v2745_v7 = vsel %vm2681_vm11, %v3505_v24, %v2713_v6 }
 0x298   :  { %v2746_v30 = vsel %vm2682_vm12, %v3506_v45, %v2714_v28 }
 0x299   :  { %v2774_v13 = vpack.c.bf16 %v2746_v30, %v2744_v46  ;;  %v2747_v61 = vsel %vm2683_vm13, %v3507_v27, %v2715_v49  ;;  %v2617_v47 = vpop.f32.mrb[40].mxu0 }
 0x29a   :  { %v2775_v60 = vpack.c.bf16 %v2747_v61, %v2745_v7  ;;  %v3508_v31 = vadd.f32 %v2617_v47, %v5201_v63  ;;  %v2619_v32 = vpop.f32.mrb[41].mxu0 }
 0x29b   :  { %v3509_v4 = vadd.f32 %v2619_v32, %v5205_v15  ;;  %v2621_v33 = vpop.f32.mrb[42].mxu0 }
 0x29c   :  { %v2716_v34 = vmul.f32 0.2, %v3508_v31  ;;  %v3510_v5 = vadd.f32 %v2621_v33, %v5201_v63  ;;  %v2623_v62 = vpop.f32.mrb[43].mxu0  ;;  %3371 = vmatprep.mubr.msk.bf16.mxu1 %vm2898_vm9, %v2775_v60  ;;  %vm2684_vm14 = vcmp.ge.f32.partialorder %v3508_v31, 0.0 }
 0x29d   :  { %v2717_v35 = vmul.f32 0.2, %v3509_v4  ;;  %v3511_v55 = vadd.f32 %v2623_v62, %v5205_v15  ;;  %2968 = vmatmul.mubr.bf16.vlgmr.msra.gmra.mrb[64].mxu1 %v2774_v13  ;;  %vm2685_vm15 = vcmp.ge.f32.partialorder %v3509_v4, 0.0 }
 0x29e   :  { %vm2686_vm0 = vcmp.ge.f32.partialorder %v3510_v5, 0.0  ;;  %v2718_v37 = vmul.f32 0.2, %v3510_v5  ;;  %v2748_v36 = vsel %vm2684_vm14, %v3508_v31, %v2716_v34 }
 0x29f   :  { %vm2687_vm1 = vcmp.ge.f32.partialorder %v3511_v55, 0.0  ;;  %v2719_v38 = vmul.f32 0.2, %v3511_v55  ;;  %v2749_v40 = vsel %vm2685_vm15, %v3509_v4, %v2717_v35 }
 0x2a0   :  { %v2750_v39 = vsel %vm2686_vm0, %v3510_v5, %v2718_v37 }
 0x2a1   :  { %v2751_v57 = vsel %vm2687_vm1, %v3511_v55, %v2719_v38  ;;  %v2627_v43 = vpop.f32.mrb[44].mxu0  ;;  %v2776_v48 = vpack.c.bf16 %v2750_v39, %v2748_v36 }
 0x2a2   :  { %v2777_v10 = vpack.c.bf16 %v2751_v57, %v2749_v40  ;;  %v3512_v41 = vadd.f32 %v2627_v43, %v5201_v63  ;;  %v2629_v58 = vpop.f32.mrb[45].mxu0 }
 0x2a3   :  { %v3513_v52 = vadd.f32 %v2629_v58, %v5205_v15  ;;  %v2631_v18 = vpop.f32.mrb[46].mxu0 }
 0x2a4   :  { %v2720_v51 = vmul.f32 0.2, %v3512_v41  ;;  %v3514_v54 = vadd.f32 %v2631_v18, %v5201_v63  ;;  %v2633_v42 = vpop.f32.mrb[47].mxu0  ;;  %3372 = vmatprep.mubr.msk.bf16.mxu1 %vm2898_vm9, %v2777_v10  ;;  %vm2688_vm2 = vcmp.ge.f32.partialorder %v3512_v41, 0.0 }
 0x2a5   :  { %v2721_v17 = vmul.f32 0.2, %v3513_v52  ;;  %v3515_v8 = vadd.f32 %v2633_v42, %v5205_v15  ;;  %2976 = vmatmul.mubr.bf16.gmra.mrb[68].mxu1 %v2776_v48  ;;  %vm2689_vm3 = vcmp.ge.f32.partialorder %v3513_v52, 0.0 }
 0x2a6   :  { %vm2690_vm6 = vcmp.ge.f32.partialorder %v3514_v54, 0.0  ;;  %v2722_v1 = vmul.f32 0.2, %v3514_v54  ;;  %v2752_v29 = vsel %vm2688_vm2, %v3512_v41, %v2720_v51 }
 0x2a7   :  { %vm2691_vm4 = vcmp.ge.f32.partialorder %v3515_v8, 0.0  ;;  %v2723_v16 = vmul.f32 0.2, %v3515_v8  ;;  %v2753_v25 = vsel %vm2689_vm3, %v3513_v52, %v2721_v17 }
 0x2a8   :  { %v2754_v22 = vsel %vm2690_vm6, %v3514_v54, %v2722_v1 }
 0x2a9   :  { %v2755_v0 = vsel %vm2691_vm4, %v3515_v8, %v2723_v16  ;;  %v2637_v19 = vpop.f32.mrb[48].mxu0  ;;  %v2778_v12 = vpack.c.bf16 %v2754_v22, %v2752_v29 }
 0x2aa   :  { %v2779_v11 = vpack.c.bf16 %v2755_v0, %v2753_v25  ;;  %v3516_v14 = vadd.f32 %v2637_v19, %v5201_v63  ;;  %v2639_v50 = vpop.f32.mrb[49].mxu0 }
 0x2ab   :  { %v3517_v2 = vadd.f32 %v2639_v50, %v5205_v15  ;;  %v2641_v3 = vpop.f32.mrb[50].mxu0 }
 0x2ac   :  { %v2724_v20 = vmul.f32 0.2, %v3516_v14  ;;  %v3518_v56 = vadd.f32 %v2641_v3, %v5201_v63  ;;  %v2643_v9 = vpop.f32.mrb[51].mxu0  ;;  %3373 = vmatprep.mubr.msk.bf16.mxu1 %vm2898_vm9, %v2779_v11  ;;  %vm2692_vm5 = vcmp.ge.f32.partialorder %v3516_v14, 0.0 }
 0x2ad   :  { %v2725_v21 = vmul.f32 0.2, %v3517_v2  ;;  %v3519_v53 = vadd.f32 %v2643_v9, %v5205_v15  ;;  %2984 = vmatmul.mubr.bf16.gmra.mrb[72].mxu1 %v2778_v12  ;;  %vm2693_vm7 = vcmp.ge.f32.partialorder %v3517_v2, 0.0 }
 0x2ae   :  { %vm2694_vm8 = vcmp.ge.f32.partialorder %v3518_v56, 0.0  ;;  %v2726_v23 = vmul.f32 0.2, %v3518_v56  ;;  %v2756_v44 = vsel %vm2692_vm5, %v3516_v14, %v2724_v20 }
 0x2af   :  { %vm2695_vm10 = vcmp.ge.f32.partialorder %v3519_v53, 0.0  ;;  %v2727_v24 = vmul.f32 0.2, %v3519_v53  ;;  %v2757_v45 = vsel %vm2693_vm7, %v3517_v2, %v2725_v21 }
 0x2b0   :  { %v2758_v26 = vsel %vm2694_vm8, %v3518_v56, %v2726_v23  ;;  %vm3072_vm8 = vcmask 130048  }
 0x2b1   :  { %v2759_v59 = vsel %vm2695_vm10, %v3519_v53, %v2727_v24  ;;  %v2647_v6 = vpop.f32.mrb[52].mxu0  ;;  %v2780_v27 = vpack.c.bf16 %v2758_v26, %v2756_v44 }
 0x2b2   :  { %v2781_v28 = vpack.c.bf16 %v2759_v59, %v2757_v45  ;;  %v3520_v49 = vadd.f32 %v2647_v6, %v5201_v63  ;;  %v2649_v46 = vpop.f32.mrb[53].mxu0 }
 0x2b3   :  { %v3521_v30 = vadd.f32 %v2649_v46, %v5205_v15  ;;  %v2651_v7 = vpop.f32.mrb[54].mxu0 }
 0x2b4   :  { %v2728_v13 = vmul.f32 0.2, %v3520_v49  ;;  %v3522_v61 = vadd.f32 %v2651_v7, %v5201_v63  ;;  %v2653_v47 = vpop.f32.mrb[55].mxu0  ;;  %3374 = vmatprep.mubr.msk.bf16.mxu1 %vm2898_vm9, %v2781_v28  ;;  %vm2696_vm11 = vcmp.ge.f32.partialorder %v3520_v49, 0.0 }
 0x2b5   :  { %v2729_v60 = vmul.f32 0.2, %v3521_v30  ;;  %v3523_v31 = vadd.f32 %v2653_v47, %v5205_v15  ;;  %2992 = vmatmul.mubr.bf16.gmra.mrb[76].mxu1 %v2780_v27  ;;  %vm2697_vm12 = vcmp.ge.f32.partialorder %v3521_v30, 0.0 }
 0x2b6   :  { %vm2698_vm13 = vcmp.ge.f32.partialorder %v3522_v61, 0.0  ;;  %v2730_v32 = vmul.f32 0.2, %v3522_v61  ;;  %v2760_v33 = vsel %vm2696_vm11, %v3520_v49, %v2728_v13 }
 0x2b7   :  { %vm2699_vm14 = vcmp.ge.f32.partialorder %v3523_v31, 0.0  ;;  %v2731_v4 = vmul.f32 0.2, %v3523_v31  ;;  %v2761_v5 = vsel %vm2697_vm12, %v3521_v30, %v2729_v60 }
 0x2b8   :  { %v2762_v34 = vsel %vm2698_vm13, %v3522_v61, %v2730_v32 }
 0x2b9   :  { %v2763_v62 = vsel %vm2699_vm14, %v3523_v31, %v2731_v4  ;;  %v2657_v35 = vpop.f32.mrb[56].mxu0  ;;  %v2782_v55 = vpack.c.bf16 %v2762_v34, %v2760_v33 }
 0x2ba   :  { %v2783_v37 = vpack.c.bf16 %v2763_v62, %v2761_v5  ;;  %v3524_v38 = vadd.f32 %v2657_v35, %v5201_v63  ;;  %v2659_v36 = vpop.f32.mrb[57].mxu0 }
 0x2bb   :  { %v3525_v39 = vadd.f32 %v2659_v36, %v5205_v15  ;;  %v2661_v40 = vpop.f32.mrb[58].mxu0 }
 0x2bc   :  { %v2732_v57 = vmul.f32 0.2, %v3524_v38  ;;  %v3526_v43 = vadd.f32 %v2661_v40, %v5201_v63  ;;  %v2663_v48 = vpop.f32.mrb[59].mxu0  ;;  %3375 = vmatprep.mubr.msk.bf16.mxu1 %vm2898_vm9, %v2783_v37  ;;  %vm2700_vm15 = vcmp.ge.f32.partialorder %v3524_v38, 0.0 }
 0x2bd   :  { %v2733_v10 = vmul.f32 0.2, %v3525_v39  ;;  %v3527_v41 = vadd.f32 %v2663_v48, %v5205_v15  ;;  %3000 = vmatmul.mubr.bf16.gmra.mrb[80].mxu1 %v2782_v55  ;;  %vm2701_vm0 = vcmp.ge.f32.partialorder %v3525_v39, 0.0 }
 0x2be   :  { %vm2702_vm1 = vcmp.ge.f32.partialorder %v3526_v43, 0.0  ;;  %v2734_v58 = vmul.f32 0.2, %v3526_v43  ;;  %v2764_v18 = vsel %vm2700_vm15, %v3524_v38, %v2732_v57 }
 0x2bf   :  { %vm2703_vm2 = vcmp.ge.f32.partialorder %v3527_v41, 0.0  ;;  %v2735_v52 = vmul.f32 0.2, %v3527_v41  ;;  %v2765_v54 = vsel %vm2701_vm0, %v3525_v39, %v2733_v10 }
 0x2c0   :  { %v2766_v51 = vsel %vm2702_vm1, %v3526_v43, %v2734_v58 }
 0x2c1   :  { %v2767_v42 = vsel %vm2703_vm2, %v3527_v41, %v2735_v52  ;;  %v2667_v17 = vpop.f32.mrb[60].mxu0  ;;  %v2784_v8 = vpack.c.bf16 %v2766_v51, %v2764_v18 }
 0x2c2   :  { %v2785_v1 = vpack.c.bf16 %v2767_v42, %v2765_v54  ;;  %v3528_v16 = vadd.f32 %v2667_v17, %v5201_v63  ;;  %v2669_v29 = vpop.f32.mrb[61].mxu0 }
 0x2c3   :  { %v3529_v22 = vadd.f32 %v2669_v29, %v5205_v15  ;;  %v2671_v25 = vpop.f32.mrb[62].mxu0 }
 0x2c4   :  { %v2736_v0 = vmul.f32 0.2, %v3528_v16  ;;  %v3530_v19 = vadd.f32 %v2671_v25, %v5201_v63  ;;  %v2673_v12 = vpop.f32.mrb[63].mxu0  ;;  %3376 = vmatprep.mubr.msk.bf16.mxu1 %vm2898_vm9, %v2785_v1  ;;  %vm2704_vm3 = vcmp.ge.f32.partialorder %v3528_v16, 0.0  ;;  %v5250_v63 = vld [vmem:[%s5338_s6] ss:$0 sm:$0xff] }
 0x2c5   :  { %v2737_v11 = vmul.f32 0.2, %v3529_v22  ;;  %v3531_v14 = vadd.f32 %v2673_v12, %v5205_v15  ;;  %3008 = vmatmul.mubr.bf16.gmra.mrb[84].mxu1 %v2784_v8  ;;  %vm2705_vm6 = vcmp.ge.f32.partialorder %v3529_v22, 0.0 }
 0x2c6   :  { %vm2706_vm4 = vcmp.ge.f32.partialorder %v3530_v19, 0.0  ;;  %v2738_v50 = vmul.f32 0.2, %v3530_v19  ;;  %v2768_v3 = vsel %vm2704_vm3, %v3528_v16, %v2736_v0 }
 0x2c7   :  { %vm2707_vm5 = vcmp.ge.f32.partialorder %v3531_v14, 0.0  ;;  %v2739_v2 = vmul.f32 0.2, %v3531_v14  ;;  %v2769_v56 = vsel %vm2705_vm6, %v3529_v22, %v2737_v11 }
 0x2c8   :  { %v2770_v20 = vsel %vm2706_vm4, %v3530_v19, %v2738_v50 }
 0x2c9   :  { %v2771_v9 = vsel %vm2707_vm5, %v3531_v14, %v2739_v2  ;;  %v2786_v21 = vpack.c.bf16 %v2770_v20, %v2768_v3 }
 0x2ca   :  { %v2787_v53 = vpack.c.bf16 %v2771_v9, %v2769_v56 }
 0x2cc   :  { %3377 = vmatprep.mubr.msk.bf16.mxu1 %vm2898_vm9, %v2787_v53 }
 0x2cd   :  { %3016 = vmatmul.mubr.bf16.gmra.mrb[88].mxu1 %v2786_v21 }
 0x368   :  { %v2961_v15 = vpop.f32.mrb[64].mxu0 }
 0x369   :  { %v2962_v23 = vadd.f32 %v5250_v63, %v2961_v15  ;;  %v2963_v24 = vpop.f32.mrb[65].mxu0 }
 0x36a   :  { %v2964_v44 = vpop.f32.mrb[66].mxu0 }
 0x36b   :  { %vm3024_vm7 = vcmp.ge.f32.partialorder %v2962_v23, 0.0  ;;  %v3040_v26 = vmul.f32 0.2, %v2962_v23  ;;  %v2965_v45 = vadd.f32 %v5250_v63, %v2964_v44  ;;  %v2966_v59 = vpop.f32.mrb[67].mxu0 }
 0x36d   :  { %v3056_v6 = vsel %vm3024_vm7, %v2962_v23, %v3040_v26  ;;  %vm3025_vm10 = vcmp.ge.f32.partialorder %v2965_v45, 0.0  ;;  %v3041_v27 = vmul.f32 0.2, %v2965_v45 }
 0x36e   :  { %3073 = vst.msk [vmem:[%s5339_s7] sm:$0xff] %vm3072_vm8, %v3056_v6 }
 0x36f   :  { %v3057_v28 = vsel %vm3025_vm10, %v2965_v45, %v3041_v27 }
 0x370   :  { %3074 = vst.msk [vmem:[%s5339_s7 + $0x8] sm:$0xff] %vm3072_vm8, %v3057_v28  ;;  %v2969_v49 = vpop.f32.mrb[64].mxu1 }
 0x371   :  { %v2970_v46 = vadd.f32 %v5250_v63, %v2969_v49  ;;  %v2971_v30 = vpop.f32.mrb[65].mxu1 }
 0x372   :  { %v2972_v7 = vpop.f32.mrb[66].mxu1 }
 0x373   :  { %vm3026_vm9 = vcmp.ge.f32.partialorder %v2970_v46, 0.0  ;;  %v3042_v13 = vmul.f32 0.2, %v2970_v46  ;;  %v2973_v61 = vadd.f32 %v5250_v63, %v2972_v7  ;;  %v2974_v47 = vpop.f32.mrb[67].mxu1 }
 0x375   :  { %v3058_v60 = vsel %vm3026_vm9, %v2970_v46, %v3042_v13  ;;  %vm3027_vm11 = vcmp.ge.f32.partialorder %v2973_v61, 0.0  ;;  %v3043_v31 = vmul.f32 0.2, %v2973_v61 }
 0x376   :  { %3075 = vst.msk [vmem:[%s5339_s7 + $0x10] sm:$0xff] %vm3072_vm8, %v3058_v60 }
 0x377   :  { %v3059_v32 = vsel %vm3027_vm11, %v2973_v61, %v3043_v31 }
 0x378   :  { %3076 = vst.msk [vmem:[%s5339_s7 + $0x18] sm:$0xff] %vm3072_vm8, %v3059_v32  ;;  %v2977_v4 = vpop.f32.mrb[68].mxu1 }
 0x379   :  { %v2978_v33 = vadd.f32 %v5250_v63, %v2977_v4  ;;  %v2979_v34 = vpop.f32.mrb[69].mxu1 }
 0x37a   :  { %v2980_v5 = vpop.f32.mrb[70].mxu1 }
 0x37b   :  { %vm3028_vm12 = vcmp.ge.f32.partialorder %v2978_v33, 0.0  ;;  %v3044_v62 = vmul.f32 0.2, %v2978_v33  ;;  %v2981_v35 = vadd.f32 %v5250_v63, %v2980_v5  ;;  %v2982_v55 = vpop.f32.mrb[71].mxu1 }
 0x37d   :  { %v3060_v37 = vsel %vm3028_vm12, %v2978_v33, %v3044_v62  ;;  %vm3029_vm13 = vcmp.ge.f32.partialorder %v2981_v35, 0.0  ;;  %v3045_v38 = vmul.f32 0.2, %v2981_v35 }
 0x37e   :  { %3077 = vst.msk [vmem:[%s5339_s7 + $0x20] sm:$0xff] %vm3072_vm8, %v3060_v37 }
 0x37f   :  { %v3061_v36 = vsel %vm3029_vm13, %v2981_v35, %v3045_v38 }
 0x380   :  { %3078 = vst.msk [vmem:[%s5339_s7 + $0x28] sm:$0xff] %vm3072_vm8, %v3061_v36  ;;  %v2985_v39 = vpop.f32.mrb[72].mxu1 }
 0x381   :  { %v2986_v40 = vadd.f32 %v5250_v63, %v2985_v39  ;;  %v2987_v57 = vpop.f32.mrb[73].mxu1 }
 0x382   :  { %v2988_v43 = vpop.f32.mrb[74].mxu1 }
 0x383   :  { %vm3030_vm14 = vcmp.ge.f32.partialorder %v2986_v40, 0.0  ;;  %v3046_v48 = vmul.f32 0.2, %v2986_v40  ;;  %v2989_v10 = vadd.f32 %v5250_v63, %v2988_v43  ;;  %v2990_v41 = vpop.f32.mrb[75].mxu1 }
 0x385   :  { %v3062_v58 = vsel %vm3030_vm14, %v2986_v40, %v3046_v48  ;;  %vm3031_vm15 = vcmp.ge.f32.partialorder %v2989_v10, 0.0  ;;  %v3047_v52 = vmul.f32 0.2, %v2989_v10 }
 0x386   :  { %3079 = vst.msk [vmem:[%s5339_s7 + $0x30] sm:$0xff] %vm3072_vm8, %v3062_v58 }
 0x387   :  { %v3063_v18 = vsel %vm3031_vm15, %v2989_v10, %v3047_v52 }
 0x388   :  { %3080 = vst.msk [vmem:[%s5339_s7 + $0x38] sm:$0xff] %vm3072_vm8, %v3063_v18  ;;  %v2993_v51 = vpop.f32.mrb[76].mxu1 }
 0x389   :  { %v2994_v54 = vadd.f32 %v5250_v63, %v2993_v51  ;;  %v2995_v42 = vpop.f32.mrb[77].mxu1 }
 0x38a   :  { %v2996_v17 = vpop.f32.mrb[78].mxu1 }
 0x38b   :  { %vm3032_vm0 = vcmp.ge.f32.partialorder %v2994_v54, 0.0  ;;  %v3048_v8 = vmul.f32 0.2, %v2994_v54  ;;  %v2997_v1 = vadd.f32 %v5250_v63, %v2996_v17  ;;  %v2998_v16 = vpop.f32.mrb[79].mxu1 }
 0x38d   :  { %v3064_v29 = vsel %vm3032_vm0, %v2994_v54, %v3048_v8  ;;  %vm3033_vm1 = vcmp.ge.f32.partialorder %v2997_v1, 0.0  ;;  %v3049_v22 = vmul.f32 0.2, %v2997_v1 }
 0x38e   :  { %3081 = vst.msk [vmem:[%s5339_s7 + $0x40] sm:$0xff] %vm3072_vm8, %v3064_v29 }
 0x38f   :  { %v3065_v25 = vsel %vm3033_vm1, %v2997_v1, %v3049_v22 }
 0x390   :  { %3082 = vst.msk [vmem:[%s5339_s7 + $0x48] sm:$0xff] %vm3072_vm8, %v3065_v25  ;;  %v3001_v0 = vpop.f32.mrb[80].mxu1 }
 0x391   :  { %v3002_v19 = vadd.f32 %v5250_v63, %v3001_v0  ;;  %v3003_v12 = vpop.f32.mrb[81].mxu1 }
 0x392   :  { %v3004_v11 = vpop.f32.mrb[82].mxu1 }
 0x393   :  { %vm3034_vm2 = vcmp.ge.f32.partialorder %v3002_v19, 0.0  ;;  %v3050_v14 = vmul.f32 0.2, %v3002_v19  ;;  %v3005_v50 = vadd.f32 %v5250_v63, %v3004_v11  ;;  %v3006_v2 = vpop.f32.mrb[83].mxu1 }
 0x395   :  { %v3066_v3 = vsel %vm3034_vm2, %v3002_v19, %v3050_v14  ;;  %vm3035_vm3 = vcmp.ge.f32.partialorder %v3005_v50, 0.0  ;;  %v3051_v20 = vmul.f32 0.2, %v3005_v50 }
 0x396   :  { %3083 = vst.msk [vmem:[%s5339_s7 + $0x50] sm:$0xff] %vm3072_vm8, %v3066_v3 }
 0x397   :  { %v3067_v56 = vsel %vm3035_vm3, %v3005_v50, %v3051_v20 }
 0x398   :  { %3084 = vst.msk [vmem:[%s5339_s7 + $0x58] sm:$0xff] %vm3072_vm8, %v3067_v56  ;;  %v3009_v9 = vpop.f32.mrb[84].mxu1 }
 0x399   :  { %v3010_v21 = vadd.f32 %v5250_v63, %v3009_v9  ;;  %v3011_v53 = vpop.f32.mrb[85].mxu1 }
 0x39a   :  { %v3012_v15 = vpop.f32.mrb[86].mxu1 }
 0x39b   :  { %vm3036_vm6 = vcmp.ge.f32.partialorder %v3010_v21, 0.0  ;;  %v3052_v23 = vmul.f32 0.2, %v3010_v21  ;;  %v3013_v24 = vadd.f32 %v5250_v63, %v3012_v15  ;;  %v3014_v44 = vpop.f32.mrb[87].mxu1 }
 0x39d   :  { %v3068_v26 = vsel %vm3036_vm6, %v3010_v21, %v3052_v23  ;;  %vm3037_vm4 = vcmp.ge.f32.partialorder %v3013_v24, 0.0  ;;  %v3053_v45 = vmul.f32 0.2, %v3013_v24 }
 0x39e   :  { %3085 = vst.msk [vmem:[%s5339_s7 + $0x60] sm:$0xff] %vm3072_vm8, %v3068_v26 }
 0x39f   :  { %v3069_v59 = vsel %vm3037_vm4, %v3013_v24, %v3053_v45 }
 0x3a0   :  { %3086 = vst.msk [vmem:[%s5339_s7 + $0x68] sm:$0xff] %vm3072_vm8, %v3069_v59  ;;  %v3017_v6 = vpop.f32.mrb[88].mxu1 }
 0x3a1   :  { %v3018_v27 = vadd.f32 %v5250_v63, %v3017_v6  ;;  %v3019_v28 = vpop.f32.mrb[89].mxu1 }
 0x3a2   :  { %v3020_v49 = vpop.f32.mrb[90].mxu1 }
 0x3a3   :  { %vm3038_vm5 = vcmp.ge.f32.partialorder %v3018_v27, 0.0  ;;  %v3054_v46 = vmul.f32 0.2, %v3018_v27  ;;  %v3021_v30 = vadd.f32 %v5250_v63, %v3020_v49  ;;  %v3022_v7 = vpop.f32.mrb[91].mxu1 }
 0x3a5   :  { %v3070_v13 = vsel %vm3038_vm5, %v3018_v27, %v3054_v46  ;;  %vm3039_vm7 = vcmp.ge.f32.partialorder %v3021_v30, 0.0  ;;  %v3055_v61 = vmul.f32 0.2, %v3021_v30 }
 0x3a6   :  { %3087 = vst.msk [vmem:[%s5339_s7 + $0x70] sm:$0xff] %vm3072_vm8, %v3070_v13 }
 0x3a7   :  { %v3071_v47 = vsel %vm3039_vm7, %v3021_v30, %v3055_v61 }
 0x3a8   :  { %3088 = vst.msk [vmem:[%s5339_s7 + $0x78] sm:$0xff] %vm3072_vm8, %v3071_v47 }

</bundles_post_ra>
